<compile_context>
chip_gen: v6e
topology: v6e:2x2x1
jax: 0.10.0
libtpu: 0.0.40
codegen_flags: <defaults>
</compile_context>

<pallas_src>
import jax
import jax.numpy as jnp
from jax import lax
import numpy as np
from jax.experimental import pallas as pl
from jax.experimental.pallas import tpu as pltpu

EMB = 128   # _BERT_TINY_EMBEDDING_SIZE (GRU input_size)
HID = 128   # GRU hidden_size


# ----------------------------------------------------------------------------
# Pallas kernel
# ----------------------------------------------------------------------------
def demb_ft_rnn_kernel(
    tmax_ref,                                   # scalar prefetch (SMEM), (n_tiles,)
    x_ref, rx_ref, idxf_ref, idxr_ref,
    wih_f_ref, whh_f_ref, bih_f_ref, bhh_f_ref,
    wih_r_ref, whh_r_ref, bih_r_ref, bhh_r_ref,
    fcw_ref, fcb_ref,
    out_ref,
    gif_ref, gir_ref, lastf_ref, lastr_ref,
):
    T, Bt, E = x_ref.shape
    H = whh_f_ref.shape[0]                      # whh is (H, 3H)

    # ---- hoisted weight loads / bias folding (once per grid step) -----------
    wih_f = wih_f_ref[...]                      # (E, 3H) bf16
    wih_r = wih_r_ref[...]
    whh_f = whh_f_ref[...]                      # (H, 3H) bf16
    whh_r = whh_r_ref[...]

    def fold_bias(bih_ref, bhh_ref):
        # r,z gate slices get (b_ih + b_hh) folded in; the n slice keeps only
        # b_in (b_hn must be added inside r * (...), PyTorch GRU semantics).
        bih = bih_ref[...]                      # (1, 3H) f32
        bhh = bhh_ref[...]
        return jnp.concatenate(
            [bih[:, :2 * H] + bhh[:, :2 * H], bih[:, 2 * H:]], axis=1)

    bias_f = fold_bias(bih_f_ref, bhh_f_ref)    # (1, 3H) f32
    bias_r = fold_bias(bih_r_ref, bhh_r_ref)
    bhh_nf = bhh_f_ref[:, 2 * H:]               # (1, H) f32, broadcast in the add
    bhh_nr = bhh_r_ref[:, 2 * H:]

    # ---- input projection: ONE flattened matmul per direction ---------------
    # (T, Bt, E) -> (T*Bt, E) is a free sublane-merge (Bt % 16 == 0).
    # Result stored in bf16 scratch (half the stores / VMEM); gate math later
    # upcasts back to f32.
    x_flat = x_ref[...].reshape(T * Bt, E)
    gif = jnp.dot(x_flat, wih_f, preferred_element_type=jnp.float32) + bias_f
    gif_ref[...] = gif.reshape(T, Bt, 3 * H).astype(jnp.bfloat16)

    rx_flat = rx_ref[...].reshape(T * Bt, E)
    gir = jnp.dot(rx_flat, wih_r, preferred_element_type=jnp.float32) + bias_r
    gir_ref[...] = gir.reshape(T, Bt, 3 * H).astype(jnp.bfloat16)

    # ---- last-visit indices (precomputed in wrapper) -------------------------
    idx_f = idxf_ref[...]                       # (Bt, 1) int32
    idx_r = idxr_ref[...]

    lastf_ref[...] = jnp.zeros_like(lastf_ref)
    lastr_ref[...] = jnp.zeros_like(lastr_ref)

    # ---- fused fwd/rev recurrence --------------------------------------------
    # Gate elementwise math stays f32 (v5e has no bf16 VPU/EUP).
    def gru_cell(gi_t, h, whh, bhh_n):
        gh = jnp.dot(h.astype(jnp.bfloat16), whh,
                     preferred_element_type=jnp.float32)            # (Bt, 3H)
        r = jax.nn.sigmoid(gi_t[:, :H] + gh[:, :H])
        z = jax.nn.sigmoid(gi_t[:, H:2 * H] + gh[:, H:2 * H])
        n = jnp.tanh(gi_t[:, 2 * H:] + r * (gh[:, 2 * H:] + bhh_n))
        return (1.0 - z) * n + z * h

    def step(t, carry):
        h_f, h_r = carry
        hf_new = gru_cell(gif_ref[t], h_f, whh_f, bhh_nf)
        hr_new = gru_cell(gir_ref[t], h_r, whh_r, bhh_nr)
        # capture the hidden state of the last true visit (in-place scratch,
        # keeps the loop carry to just the two hidden states)
        lastf_ref[...] = jnp.where(idx_f == t, hf_new, lastf_ref[...])
        lastr_ref[...] = jnp.where(idx_r == t, hr_new, lastr_ref[...])
        return hf_new, hr_new

    zeros = jnp.zeros((Bt, H), jnp.float32)
    # dynamic trip count: only run to this tile's last true visit
    t_max = tmax_ref[pl.program_id(0)]
    lax.fori_loop(0, t_max, step, (zeros, zeros))

    # ---- Linear(256 -> 1) + Sigmoid ------------------------------------------
    cat = jnp.concatenate([lastf_ref[...], lastr_ref[...]], axis=1)  # (Bt, 2H)
    logits = jnp.sum(cat * fcw_ref[...], axis=1, keepdims=True) + fcb_ref[...]
    out_ref[...] = jax.nn.sigmoid(logits)


# ----------------------------------------------------------------------------
# Wrapper
# ----------------------------------------------------------------------------
def _round_up(n, m):
    return ((n + m - 1) // m) * m


def _pick_bt(B):
    """Batch tile: multiple of 16 (bf16 sublane packing); >=2 grid steps when
    possible so v7x can shard across both TensorCores."""
    b16 = _round_up(B, 16)
    if b16 >= 128:
        return 64
    if b16 >= 32:
        return _round_up(b16 // 2, 16)
    return b16


def _vmem_limit_bytes():
    try:
        cap = int(pltpu.get_tpu_info().vmem_capacity_bytes)
    except Exception:
        cap = 64 << 20                      # conservative (v7x per-TC VMEM)
    return max(32 << 20, min(100 << 20, cap - (8 << 20)))


def demb_ft_rnn_forward(x, masks, rev_x, rev_masks, params):
    """x, rev_x: (B, T, EMB); masks, rev_masks: (B, T).  Returns probs (B,)."""
    B, T, E = x.shape
    H = HID

    Bt = _pick_bt(B)
    B_pad = _round_up(B, Bt)
    pad = B_pad - B
    n_tiles = B_pad // Bt

    def prep_seq(a):
        a = a.astype(jnp.bfloat16)                        # cast BEFORE pad/transpose
        a = jnp.pad(a, ((0, pad), (0, 0), (0, 0)))
        return jnp.transpose(a, (1, 0, 2))                # (T, B_pad, E)

    def last_idx(m):
        lens = jnp.sum(m.astype(jnp.int32), axis=1)
        idx = jnp.maximum(lens - 1, 0).astype(jnp.int32)  # lens==0 -> index 0
        return jnp.pad(idx, (0, pad))[:, None]            # (B_pad, 1)

    x_t, rx_t = prep_seq(x), prep_seq(rev_x)
    idx_f, idx_r = last_idx(masks), last_idx(rev_masks)

    # per-batch-tile dynamic recurrence bound (scalar-prefetched into SMEM)
    tile_idx = jnp.maximum(idx_f, idx_r)[:, 0].reshape(n_tiles, Bt)
    tmax = (jnp.max(tile_idx, axis=1) + 1).astype(jnp.int32)        # (n_tiles,)

    bf16 = lambda w: w.astype(jnp.bfloat16)
    f32 = lambda w: w.astype(jnp.float32)

    inputs = (
        tmax,
        x_t, rx_t, idx_f, idx_r,
        bf16(params["wih_f"]), bf16(params["whh_f"]),
        f32(params["bih_f"]), f32(params["bhh_f"]),
        bf16(params["wih_r"]), bf16(params["whh_r"]),
        f32(params["bih_r"]), f32(params["bhh_r"]),
        f32(params["fc_w"]), f32(params["fc_b"]),
    )

    seq_spec = pl.BlockSpec((T, Bt, E), lambda b, s: (0, b, 0))
    idx_spec = pl.BlockSpec((Bt, 1), lambda b, s: (b, 0))
    const = lambda shape: pl.BlockSpec(shape, lambda b, s: (0, 0))  # resident weights

    grid_spec = pltpu.PrefetchScalarGridSpec(
        num_scalar_prefetch=1,
        grid=(n_tiles,),
        in_specs=[
            seq_spec, seq_spec, idx_spec, idx_spec,
            const((E, 3 * H)), const((H, 3 * H)),
            const((1, 3 * H)), const((1, 3 * H)),
            const((E, 3 * H)), const((H, 3 * H)),
            const((1, 3 * H)), const((1, 3 * H)),
            const((1, 2 * H)), const((1, 1)),
        ],
        out_specs=pl.BlockSpec((Bt, 1), lambda b, s: (b, 0)),
        scratch_shapes=[
            pltpu.VMEM((T, Bt, 3 * H), jnp.bfloat16),   # gi forward
            pltpu.VMEM((T, Bt, 3 * H), jnp.bfloat16),   # gi reverse
            pltpu.VMEM((Bt, H), jnp.float32),           # last_f
            pltpu.VMEM((Bt, H), jnp.float32),           # last_r
        ],
    )

    out = pl.pallas_call(
        demb_ft_rnn_kernel,
        out_shape=jax.ShapeDtypeStruct((B_pad, 1), jnp.float32),
        grid_spec=grid_spec,
        compiler_params=pltpu.CompilerParams(
            dimension_semantics=("parallel",),
            vmem_limit_bytes=_vmem_limit_bytes()),
    )(*inputs)
    return out[:B, 0]


# ----------------------------------------------------------------------------
# Deterministic parameter init (PyTorch-style uniform(-1/sqrt(H), 1/sqrt(H))).
# Weights stored pre-transposed: wih = weight_ih_l0.T (E,3H), whh = (H,3H),
# biases (1,3H); fc_w (1,2H); fc_b (1,1).
# ----------------------------------------------------------------------------
def init_params(key):
    k_gru = 1.0 / np.sqrt(HID)
    k_fc = 1.0 / np.sqrt(2 * HID)
    keys = jax.random.split(key, 10)
    u = lambda k, shp, s: jax.random.uniform(k, shp, jnp.float32, -s, s)
    return {
        "wih_f": u(keys[0], (EMB, 3 * HID), k_gru),
        "whh_f": u(keys[1], (HID, 3 * HID), k_gru),
        "bih_f": u(keys[2], (1, 3 * HID), k_gru),
        "bhh_f": u(keys[3], (1, 3 * HID), k_gru),
        "wih_r": u(keys[4], (EMB, 3 * HID), k_gru),
        "whh_r": u(keys[5], (HID, 3 * HID), k_gru),
        "bih_r": u(keys[6], (1, 3 * HID), k_gru),
        "bhh_r": u(keys[7], (1, 3 * HID), k_gru),
        "fc_w": u(keys[8], (1, 2 * HID), k_fc),
        "fc_b": u(keys[9], (1, 1), k_fc),
    }


# ----------------------------------------------------------------------------
# Pure-JAX reference using the same mixed precision (bf16 matmul operands,
# bf16 gi storage, f32 accumulation / gate math) so the kernel is validated
# tightly.
# ----------------------------------------------------------------------------
def reference_forward(x, masks, rev_x, rev_masks, params):
    def gru_dir(seq, m, wih, whh, bih, bhh):
        B, T, E = seq.shape
        H = whh.shape[0]
        wih_b = wih.astype(jnp.bfloat16)
        whh_b = whh.astype(jnp.bfloat16)
        seq_b = seq.astype(jnp.bfloat16)

        bias = jnp.concatenate(
            [bih[:, :2 * H] + bhh[:, :2 * H], bih[:, 2 * H:]], axis=1)
        bhh_n = bhh[:, 2 * H:]

        gi_all = (jnp.einsum("bte,eh->bth", seq_b, wih_b,
                             preferred_element_type=jnp.float32)
                  + bias[None]).astype(jnp.bfloat16)      # matches bf16 gi scratch

        def cell(h, gi):
            gi = gi.astype(jnp.float32)
            gh = jnp.dot(h.astype(jnp.bfloat16), whh_b,
                         preferred_element_type=jnp.float32)
            r = jax.nn.sigmoid(gi[:, :H] + gh[:, :H])
            z = jax.nn.sigmoid(gi[:, H:2 * H] + gh[:, H:2 * H])
            n = jnp.tanh(gi[:, 2 * H:] + r * (gh[:, 2 * H:] + bhh_n))
            h_new = (1.0 - z) * n + z * h
            return h_new, h_new

        h0 = jnp.zeros((B, H), jnp.float32)
        _, hs = lax.scan(cell, h0, jnp.transpose(gi_all, (1, 0, 2)))
        hs = jnp.transpose(hs, (1, 0, 2))                  # (B, T, H)
        lens = jnp.sum(m, axis=1).astype(jnp.int32)
        idx = jnp.maximum(lens - 1, 0)
        return hs[jnp.arange(B), idx]

    hf = gru_dir(x.astype(jnp.float32), masks,
                 params["wih_f"], params["whh_f"], params["bih_f"], params["bhh_f"])
    hr = gru_dir(rev_x.astype(jnp.float32), rev_masks,
                 params["wih_r"], params["whh_r"], params["bih_r"], params["bhh_r"])
    cat = jnp.concatenate([hf, hr], axis=1)
    logits = jnp.sum(cat * params["fc_w"], axis=1) + params["fc_b"][0, 0]
    return jax.nn.sigmoid(logits)


if __name__ == "__main__":
    B, T = 4, 8
    key = jax.random.PRNGKey(0)
    k_p, k_x, k_rx = jax.random.split(key, 3)

    params = init_params(k_p)
    x = jax.random.normal(k_x, (B, T, EMB), jnp.float32)
    rev_x = jax.random.normal(k_rx, (B, T, EMB), jnp.float32)

    # padding masks: per-row prefix of true visits (one row fully padded to hit
    # the lens == 0 -> index 0 branch of demb_get_last_visit)
    lengths = jnp.array([8, 3, 1, 0], dtype=jnp.int32)
    masks = (jnp.arange(T)[None, :] < lengths[:, None]).astype(jnp.float32)
    rev_masks = masks

    probs = demb_ft_rnn_forward(x, masks, rev_x, rev_masks, params)
    probs = jax.block_until_ready(probs)

    ref = reference_forward(x, masks, rev_x, rev_masks, params)
    assert probs.shape == (B,)
    np.testing.assert_allclose(np.asarray(probs), np.asarray(ref),
                               rtol=1e-3, atol=1e-3)

    print("KERNEL_OK")
</pallas_src>

<mosaic_0001>
module attributes {stable_mosaic.version = 11 : i64} {
  func.func @demb_ft_rnn_kernel(%arg0: i32, %arg1: memref<1xi32, #tpu.memory_space<smem>>, %arg2: memref<8x16x128xbf16, #tpu.memory_space<vmem>>, %arg3: memref<8x16x128xbf16, #tpu.memory_space<vmem>>, %arg4: memref<16x1xi32, #tpu.memory_space<vmem>>, %arg5: memref<16x1xi32, #tpu.memory_space<vmem>>, %arg6: memref<128x384xbf16, #tpu.memory_space<vmem>>, %arg7: memref<128x384xbf16, #tpu.memory_space<vmem>>, %arg8: memref<1x384xf32, #tpu.memory_space<vmem>>, %arg9: memref<1x384xf32, #tpu.memory_space<vmem>>, %arg10: memref<128x384xbf16, #tpu.memory_space<vmem>>, %arg11: memref<128x384xbf16, #tpu.memory_space<vmem>>, %arg12: memref<1x384xf32, #tpu.memory_space<vmem>>, %arg13: memref<1x384xf32, #tpu.memory_space<vmem>>, %arg14: memref<1x256xf32, #tpu.memory_space<vmem>>, %arg15: memref<1x1xf32, #tpu.memory_space<vmem>>, %arg16: memref<16x1xf32, #tpu.memory_space<vmem>>, %arg17: memref<8x16x384xbf16, #tpu.memory_space<vmem>>, %arg18: memref<8x16x384xbf16, #tpu.memory_space<vmem>>, %arg19: memref<16x128xf32, #tpu.memory_space<vmem>>, %arg20: memref<16x128xf32, #tpu.memory_space<vmem>>) attributes {dimension_semantics = [#tpu.dimension_semantics<parallel>], iteration_bounds = array<i64: 1>, scalar_prefetch = 1 : i64, scratch_operands = 4 : i64, tpu.core_type = #tpu.core_type<tc>, window_params = [{transform_indices = @transform_0, window_bounds = array<i64: 8, 16, 128>}, {transform_indices = @transform_1, window_bounds = array<i64: 8, 16, 128>}, {transform_indices = @transform_2, window_bounds = array<i64: 16, 1>}, {transform_indices = @transform_3, window_bounds = array<i64: 16, 1>}, {pipeline_mode = #tpu.pipeline_mode<synchronous>, transform_indices = @transform_4, window_bounds = array<i64: 128, 384>}, {pipeline_mode = #tpu.pipeline_mode<synchronous>, transform_indices = @transform_5, window_bounds = array<i64: 128, 384>}, {pipeline_mode = #tpu.pipeline_mode<synchronous>, transform_indices = @transform_6, window_bounds = array<i64: 1, 384>}, {pipeline_mode = #tpu.pipeline_mode<synchronous>, transform_indices = @transform_7, window_bounds = array<i64: 1, 384>}, {pipeline_mode = #tpu.pipeline_mode<synchronous>, transform_indices = @transform_8, window_bounds = array<i64: 128, 384>}, {pipeline_mode = #tpu.pipeline_mode<synchronous>, transform_indices = @transform_9, window_bounds = array<i64: 128, 384>}, {pipeline_mode = #tpu.pipeline_mode<synchronous>, transform_indices = @transform_10, window_bounds = array<i64: 1, 384>}, {pipeline_mode = #tpu.pipeline_mode<synchronous>, transform_indices = @transform_11, window_bounds = array<i64: 1, 384>}, {pipeline_mode = #tpu.pipeline_mode<synchronous>, transform_indices = @transform_12, window_bounds = array<i64: 1, 256>}, {pipeline_mode = #tpu.pipeline_mode<synchronous>, transform_indices = @transform_13, window_bounds = array<i64: 1, 1>}, {transform_indices = @transform_14, window_bounds = array<i64: 16, 1>}]} {
    %c0 = arith.constant 0 : index
    %c0_0 = arith.constant 0 : index
    %0 = vector.load %arg6[%c0, %c0_0] : memref<128x384xbf16, #tpu.memory_space<vmem>>, vector<128x384xbf16>
    %c0_1 = arith.constant 0 : index
    %c0_2 = arith.constant 0 : index
    %1 = vector.load %arg10[%c0_1, %c0_2] : memref<128x384xbf16, #tpu.memory_space<vmem>>, vector<128x384xbf16>
    %c0_3 = arith.constant 0 : index
    %c0_4 = arith.constant 0 : index
    %2 = vector.load %arg7[%c0_3, %c0_4] : memref<128x384xbf16, #tpu.memory_space<vmem>>, vector<128x384xbf16>
    %c0_5 = arith.constant 0 : index
    %c0_6 = arith.constant 0 : index
    %3 = vector.load %arg11[%c0_5, %c0_6] : memref<128x384xbf16, #tpu.memory_space<vmem>>, vector<128x384xbf16>
    %c0_7 = arith.constant 0 : index
    %c0_8 = arith.constant 0 : index
    %4 = vector.load %arg8[%c0_7, %c0_8] : memref<1x384xf32, #tpu.memory_space<vmem>>, vector<1x384xf32>
    %c0_9 = arith.constant 0 : index
    %c0_10 = arith.constant 0 : index
    %5 = vector.load %arg9[%c0_9, %c0_10] : memref<1x384xf32, #tpu.memory_space<vmem>>, vector<1x384xf32>
    %6 = vector.extract_strided_slice %4 {offsets = [0, 0], sizes = [1, 256], strides = [1, 1]} : vector<1x384xf32> to vector<1x256xf32>
    %7 = vector.extract_strided_slice %5 {offsets = [0, 0], sizes = [1, 256], strides = [1, 1]} : vector<1x384xf32> to vector<1x256xf32>
    %8 = arith.addf %6, %7 : vector<1x256xf32>
    %9 = vector.extract_strided_slice %4 {offsets = [0, 256], sizes = [1, 128], strides = [1, 1]} : vector<1x384xf32> to vector<1x128xf32>
    %10 = tpu.concatenate %8, %9 in 1 : vector<1x256xf32>, vector<1x128xf32> -> vector<1x384xf32>
    %c0_11 = arith.constant 0 : index
    %c0_12 = arith.constant 0 : index
    %11 = vector.load %arg12[%c0_11, %c0_12] : memref<1x384xf32, #tpu.memory_space<vmem>>, vector<1x384xf32>
    %c0_13 = arith.constant 0 : index
    %c0_14 = arith.constant 0 : index
    %12 = vector.load %arg13[%c0_13, %c0_14] : memref<1x384xf32, #tpu.memory_space<vmem>>, vector<1x384xf32>
    %13 = vector.extract_strided_slice %11 {offsets = [0, 0], sizes = [1, 256], strides = [1, 1]} : vector<1x384xf32> to vector<1x256xf32>
    %14 = vector.extract_strided_slice %12 {offsets = [0, 0], sizes = [1, 256], strides = [1, 1]} : vector<1x384xf32> to vector<1x256xf32>
    %15 = arith.addf %13, %14 : vector<1x256xf32>
    %16 = vector.extract_strided_slice %11 {offsets = [0, 256], sizes = [1, 128], strides = [1, 1]} : vector<1x384xf32> to vector<1x128xf32>
    %17 = tpu.concatenate %15, %16 in 1 : vector<1x256xf32>, vector<1x128xf32> -> vector<1x384xf32>
    %c0_15 = arith.constant 0 : index
    %c256 = arith.constant 256 : index
    %18 = vector.load %arg9[%c0_15, %c256] : memref<1x384xf32, #tpu.memory_space<vmem>>, vector<1x128xf32>
    %c0_16 = arith.constant 0 : index
    %c256_17 = arith.constant 256 : index
    %19 = vector.load %arg13[%c0_16, %c256_17] : memref<1x384xf32, #tpu.memory_space<vmem>>, vector<1x128xf32>
    %c0_18 = arith.constant 0 : index
    %c0_19 = arith.constant 0 : index
    %c0_20 = arith.constant 0 : index
    %20 = vector.load %arg2[%c0_18, %c0_19, %c0_20] : memref<8x16x128xbf16, #tpu.memory_space<vmem>>, vector<8x16x128xbf16>
    %21 = vector.shape_cast %20 : vector<8x16x128xbf16> to vector<128x128xbf16>
    %cst = arith.constant dense<0.000000e+00> : vector<128x384xf32>
    %22 = tpu.matmul %21, %0, %cst {dimension_numbers = #tpu.dot_dimension_numbers<[1], [0], [0], [1], [0, 0, 1, 1], [], []>} : vector<128x128xbf16>, vector<128x384xbf16>, vector<128x384xf32> -> vector<128x384xf32>
    %23 = vector.broadcast %10 : vector<1x384xf32> to vector<128x384xf32>
    %24 = arith.addf %22, %23 : vector<128x384xf32>
    %25 = vector.shape_cast %24 : vector<128x384xf32> to vector<8x16x384xf32>
    %26 = arith.truncf %25 : vector<8x16x384xf32> to vector<8x16x384xbf16>
    %c0_21 = arith.constant 0 : index
    %c0_22 = arith.constant 0 : index
    %c0_23 = arith.constant 0 : index
    %27 = vector.load %arg17[%c0_21, %c0_22, %c0_23] : memref<8x16x384xbf16, #tpu.memory_space<vmem>>, vector<8x16x384xbf16>
    tpu.vector_store %arg17[%c0_21, %c0_22, %c0_23], %26 {strides = array<i32>} : memref<8x16x384xbf16, #tpu.memory_space<vmem>>, vector<8x16x384xbf16>,
    %c0_24 = arith.constant 0 : index
    %c0_25 = arith.constant 0 : index
    %c0_26 = arith.constant 0 : index
    %28 = vector.load %arg3[%c0_24, %c0_25, %c0_26] : memref<8x16x128xbf16, #tpu.memory_space<vmem>>, vector<8x16x128xbf16>
    %29 = vector.shape_cast %28 : vector<8x16x128xbf16> to vector<128x128xbf16>
    %cst_27 = arith.constant dense<0.000000e+00> : vector<128x384xf32>
    %30 = tpu.matmul %29, %1, %cst_27 {dimension_numbers = #tpu.dot_dimension_numbers<[1], [0], [0], [1], [0, 0, 1, 1], [], []>} : vector<128x128xbf16>, vector<128x384xbf16>, vector<128x384xf32> -> vector<128x384xf32>
    %31 = vector.broadcast %17 : vector<1x384xf32> to vector<128x384xf32>
    %32 = arith.addf %30, %31 : vector<128x384xf32>
    %33 = vector.shape_cast %32 : vector<128x384xf32> to vector<8x16x384xf32>
    %34 = arith.truncf %33 : vector<8x16x384xf32> to vector<8x16x384xbf16>
    %c0_28 = arith.constant 0 : index
    %c0_29 = arith.constant 0 : index
    %c0_30 = arith.constant 0 : index
    %35 = vector.load %arg18[%c0_28, %c0_29, %c0_30] : memref<8x16x384xbf16, #tpu.memory_space<vmem>>, vector<8x16x384xbf16>
    tpu.vector_store %arg18[%c0_28, %c0_29, %c0_30], %34 {strides = array<i32>} : memref<8x16x384xbf16, #tpu.memory_space<vmem>>, vector<8x16x384xbf16>,
    %c0_31 = arith.constant 0 : index
    %c0_32 = arith.constant 0 : index
    %36 = vector.load %arg4[%c0_31, %c0_32] : memref<16x1xi32, #tpu.memory_space<vmem>>, vector<16x1xi32>
    %c0_33 = arith.constant 0 : index
    %c0_34 = arith.constant 0 : index
    %37 = vector.load %arg5[%c0_33, %c0_34] : memref<16x1xi32, #tpu.memory_space<vmem>>, vector<16x1xi32>
    %cst_35 = arith.constant 0.000000e+00 : f32
    %38 = vector.broadcast %cst_35 : f32 to vector<16x128xf32>
    %c0_36 = arith.constant 0 : index
    %c0_37 = arith.constant 0 : index
    %39 = vector.load %arg19[%c0_36, %c0_37] : memref<16x128xf32, #tpu.memory_space<vmem>>, vector<16x128xf32>
    tpu.vector_store %arg19[%c0_36, %c0_37], %38 {strides = array<i32>} : memref<16x128xf32, #tpu.memory_space<vmem>>, vector<16x128xf32>,
    %cst_38 = arith.constant 0.000000e+00 : f32
    %40 = vector.broadcast %cst_38 : f32 to vector<16x128xf32>
    %c0_39 = arith.constant 0 : index
    %c0_40 = arith.constant 0 : index
    %41 = vector.load %arg20[%c0_39, %c0_40] : memref<16x128xf32, #tpu.memory_space<vmem>>, vector<16x128xf32>
    tpu.vector_store %arg20[%c0_39, %c0_40], %40 {strides = array<i32>} : memref<16x128xf32, #tpu.memory_space<vmem>>, vector<16x128xf32>,
    %cst_41 = arith.constant 0.000000e+00 : f32
    %42 = vector.broadcast %cst_41 : f32 to vector<16x128xf32>
    %43 = arith.index_cast %arg0 : i32 to index
    %44 = memref.load %arg1[%43] : memref<1xi32, #tpu.memory_space<smem>>
    %c0_i32 = arith.constant 0 : i32
    %45 = arith.subi %44, %c0_i32 : i32
    %46 = arith.addi %c0_i32, %45 : i32
    %c1_i32 = arith.constant 1 : i32
    %47:2 = scf.for %arg21 = %c0_i32 to %46 step %c1_i32 iter_args(%arg22 = %42, %arg23 = %42) -> (vector<16x128xf32>, vector<16x128xf32>)  : i32 {
      %65 = arith.index_cast %arg21 : i32 to index
      %c0_54 = arith.constant 0 : index
      %c0_55 = arith.constant 0 : index
      %66 = vector.load %arg17[%65, %c0_54, %c0_55] : memref<8x16x384xbf16, #tpu.memory_space<vmem>>, vector<1x16x384xbf16>
      %67 = vector.shape_cast %66 : vector<1x16x384xbf16> to vector<16x384xbf16>
      %68 = arith.truncf %arg22 : vector<16x128xf32> to vector<16x128xbf16>
      %cst_56 = arith.constant dense<0.000000e+00> : vector<16x384xf32>
      %69 = tpu.matmul %68, %2, %cst_56 {dimension_numbers = #tpu.dot_dimension_numbers<[1], [0], [0], [1], [0, 0, 1, 1], [], []>} : vector<16x128xbf16>, vector<128x384xbf16>, vector<16x384xf32> -> vector<16x384xf32>
      %70 = vector.extract_strided_slice %67 {offsets = [0, 0], sizes = [16, 128], strides = [1, 1]} : vector<16x384xbf16> to vector<16x128xbf16>
      %71 = vector.extract_strided_slice %69 {offsets = [0, 0], sizes = [16, 128], strides = [1, 1]} : vector<16x384xf32> to vector<16x128xf32>
      %72 = arith.extf %70 : vector<16x128xbf16> to vector<16x128xf32>
      %73 = arith.addf %72, %71 : vector<16x128xf32>
      %74 = arith.negf %73 : vector<16x128xf32>
      %75 = math.exp %74 : vector<16x128xf32>
      %cst_57 = arith.constant 1.000000e+00 : f32
      %76 = vector.broadcast %cst_57 : f32 to vector<16x128xf32>
      %77 = arith.addf %76, %75 : vector<16x128xf32>
      %78 = arith.divf %76, %77 : vector<16x128xf32>
      %79 = vector.extract_strided_slice %67 {offsets = [0, 128], sizes = [16, 128], strides = [1, 1]} : vector<16x384xbf16> to vector<16x128xbf16>
      %80 = vector.extract_strided_slice %69 {offsets = [0, 128], sizes = [16, 128], strides = [1, 1]} : vector<16x384xf32> to vector<16x128xf32>
      %81 = arith.extf %79 : vector<16x128xbf16> to vector<16x128xf32>
      %82 = arith.addf %81, %80 : vector<16x128xf32>
      %83 = arith.negf %82 : vector<16x128xf32>
      %84 = math.exp %83 : vector<16x128xf32>
      %cst_58 = arith.constant 1.000000e+00 : f32
      %85 = vector.broadcast %cst_58 : f32 to vector<16x128xf32>
      %86 = arith.addf %85, %84 : vector<16x128xf32>
      %87 = arith.divf %85, %86 : vector<16x128xf32>
      %88 = vector.extract_strided_slice %67 {offsets = [0, 256], sizes = [16, 128], strides = [1, 1]} : vector<16x384xbf16> to vector<16x128xbf16>
      %89 = vector.extract_strided_slice %69 {offsets = [0, 256], sizes = [16, 128], strides = [1, 1]} : vector<16x384xf32> to vector<16x128xf32>
      %90 = vector.broadcast %18 : vector<1x128xf32> to vector<16x128xf32>
      %91 = arith.addf %89, %90 : vector<16x128xf32>
      %92 = arith.mulf %78, %91 : vector<16x128xf32>
      %93 = arith.extf %88 : vector<16x128xbf16> to vector<16x128xf32>
      %94 = arith.addf %93, %92 : vector<16x128xf32>
      %95 = math.tanh %94 : vector<16x128xf32>
      %cst_59 = arith.constant 1.000000e+00 : f32
      %96 = vector.broadcast %cst_59 : f32 to vector<16x128xf32>
      %97 = arith.subf %96, %87 : vector<16x128xf32>
      %98 = arith.mulf %97, %95 : vector<16x128xf32>
      %99 = arith.mulf %87, %arg22 : vector<16x128xf32>
      %100 = arith.addf %98, %99 : vector<16x128xf32>
      %101 = arith.index_cast %arg21 : i32 to index
      %c0_60 = arith.constant 0 : index
      %c0_61 = arith.constant 0 : index
      %102 = vector.load %arg18[%101, %c0_60, %c0_61] : memref<8x16x384xbf16, #tpu.memory_space<vmem>>, vector<1x16x384xbf16>
      %103 = vector.shape_cast %102 : vector<1x16x384xbf16> to vector<16x384xbf16>
      %104 = arith.truncf %arg23 : vector<16x128xf32> to vector<16x128xbf16>
      %cst_62 = arith.constant dense<0.000000e+00> : vector<16x384xf32>
      %105 = tpu.matmul %104, %3, %cst_62 {dimension_numbers = #tpu.dot_dimension_numbers<[1], [0], [0], [1], [0, 0, 1, 1], [], []>} : vector<16x128xbf16>, vector<128x384xbf16>, vector<16x384xf32> -> vector<16x384xf32>
      %106 = vector.extract_strided_slice %103 {offsets = [0, 0], sizes = [16, 128], strides = [1, 1]} : vector<16x384xbf16> to vector<16x128xbf16>
      %107 = vector.extract_strided_slice %105 {offsets = [0, 0], sizes = [16, 128], strides = [1, 1]} : vector<16x384xf32> to vector<16x128xf32>
      %108 = arith.extf %106 : vector<16x128xbf16> to vector<16x128xf32>
      %109 = arith.addf %108, %107 : vector<16x128xf32>
      %110 = arith.negf %109 : vector<16x128xf32>
      %111 = math.exp %110 : vector<16x128xf32>
      %cst_63 = arith.constant 1.000000e+00 : f32
      %112 = vector.broadcast %cst_63 : f32 to vector<16x128xf32>
      %113 = arith.addf %112, %111 : vector<16x128xf32>
      %114 = arith.divf %112, %113 : vector<16x128xf32>
      %115 = vector.extract_strided_slice %103 {offsets = [0, 128], sizes = [16, 128], strides = [1, 1]} : vector<16x384xbf16> to vector<16x128xbf16>
      %116 = vector.extract_strided_slice %105 {offsets = [0, 128], sizes = [16, 128], strides = [1, 1]} : vector<16x384xf32> to vector<16x128xf32>
      %117 = arith.extf %115 : vector<16x128xbf16> to vector<16x128xf32>
      %118 = arith.addf %117, %116 : vector<16x128xf32>
      %119 = arith.negf %118 : vector<16x128xf32>
      %120 = math.exp %119 : vector<16x128xf32>
      %cst_64 = arith.constant 1.000000e+00 : f32
      %121 = vector.broadcast %cst_64 : f32 to vector<16x128xf32>
      %122 = arith.addf %121, %120 : vector<16x128xf32>
      %123 = arith.divf %121, %122 : vector<16x128xf32>
      %124 = vector.extract_strided_slice %103 {offsets = [0, 256], sizes = [16, 128], strides = [1, 1]} : vector<16x384xbf16> to vector<16x128xbf16>
      %125 = vector.extract_strided_slice %105 {offsets = [0, 256], sizes = [16, 128], strides = [1, 1]} : vector<16x384xf32> to vector<16x128xf32>
      %126 = vector.broadcast %19 : vector<1x128xf32> to vector<16x128xf32>
      %127 = arith.addf %125, %126 : vector<16x128xf32>
      %128 = arith.mulf %114, %127 : vector<16x128xf32>
      %129 = arith.extf %124 : vector<16x128xbf16> to vector<16x128xf32>
      %130 = arith.addf %129, %128 : vector<16x128xf32>
      %131 = math.tanh %130 : vector<16x128xf32>
      %cst_65 = arith.constant 1.000000e+00 : f32
      %132 = vector.broadcast %cst_65 : f32 to vector<16x128xf32>
      %133 = arith.subf %132, %123 : vector<16x128xf32>
      %134 = arith.mulf %133, %131 : vector<16x128xf32>
      %135 = arith.mulf %123, %arg23 : vector<16x128xf32>
      %136 = arith.addf %134, %135 : vector<16x128xf32>
      %137 = vector.broadcast %arg21 : i32 to vector<16x1xi32>
      %138 = arith.cmpi eq, %36, %137 : vector<16x1xi32>
      %c0_66 = arith.constant 0 : index
      %c0_67 = arith.constant 0 : index
      %139 = vector.load %arg19[%c0_66, %c0_67] : memref<16x128xf32, #tpu.memory_space<vmem>>, vector<16x128xf32>
      %140 = vector.shape_cast %138 : vector<16x1xi1> to vector<16x1xi1>
      %141 = vector.broadcast %140 : vector<16x1xi1> to vector<16x128xi1>
      %142 = arith.select %141, %100, %139 : vector<16x128xi1>, vector<16x128xf32>
      %c0_68 = arith.constant 0 : index
      %c0_69 = arith.constant 0 : index
      %143 = vector.load %arg19[%c0_68, %c0_69] : memref<16x128xf32, #tpu.memory_space<vmem>>, vector<16x128xf32>
      tpu.vector_store %arg19[%c0_68, %c0_69], %142 {strides = array<i32>} : memref<16x128xf32, #tpu.memory_space<vmem>>, vector<16x128xf32>,
      %144 = vector.broadcast %arg21 : i32 to vector<16x1xi32>
      %145 = arith.cmpi eq, %37, %144 : vector<16x1xi32>
      %c0_70 = arith.constant 0 : index
      %c0_71 = arith.constant 0 : index
      %146 = vector.load %arg20[%c0_70, %c0_71] : memref<16x128xf32, #tpu.memory_space<vmem>>, vector<16x128xf32>
      %147 = vector.shape_cast %145 : vector<16x1xi1> to vector<16x1xi1>
      %148 = vector.broadcast %147 : vector<16x1xi1> to vector<16x128xi1>
      %149 = arith.select %148, %136, %146 : vector<16x128xi1>, vector<16x128xf32>
      %c0_72 = arith.constant 0 : index
      %c0_73 = arith.constant 0 : index
      %150 = vector.load %arg20[%c0_72, %c0_73] : memref<16x128xf32, #tpu.memory_space<vmem>>, vector<16x128xf32>
      tpu.vector_store %arg20[%c0_72, %c0_73], %149 {strides = array<i32>} : memref<16x128xf32, #tpu.memory_space<vmem>>, vector<16x128xf32>,
      scf.yield %100, %136 : vector<16x128xf32>, vector<16x128xf32>
    }
    %c0_42 = arith.constant 0 : index
    %c0_43 = arith.constant 0 : index
    %48 = vector.load %arg19[%c0_42, %c0_43] : memref<16x128xf32, #tpu.memory_space<vmem>>, vector<16x128xf32>
    %c0_44 = arith.constant 0 : index
    %c0_45 = arith.constant 0 : index
    %49 = vector.load %arg20[%c0_44, %c0_45] : memref<16x128xf32, #tpu.memory_space<vmem>>, vector<16x128xf32>
    %50 = tpu.concatenate %48, %49 in 1 : vector<16x128xf32>, vector<16x128xf32> -> vector<16x256xf32>
    %c0_46 = arith.constant 0 : index
    %c0_47 = arith.constant 0 : index
    %51 = vector.load %arg14[%c0_46, %c0_47] : memref<1x256xf32, #tpu.memory_space<vmem>>, vector<1x256xf32>
    %52 = vector.broadcast %51 : vector<1x256xf32> to vector<16x256xf32>
    %53 = arith.mulf %50, %52 : vector<16x256xf32>
    %cst_48 = arith.constant dense<0.000000e+00> : vector<16xf32>
    %54 = vector.multi_reduction <add>, %53, %cst_48 [1] : vector<16x256xf32> to vector<16xf32>
    %55 = vector.shape_cast %54 : vector<16xf32> to vector<16x1xf32>
    %c0_49 = arith.constant 0 : index
    %c0_50 = arith.constant 0 : index
    %56 = vector.load %arg15[%c0_49, %c0_50] : memref<1x1xf32, #tpu.memory_space<vmem>>, vector<1x1xf32>
    %57 = vector.broadcast %56 : vector<1x1xf32> to vector<16x1xf32>
    %58 = arith.addf %55, %57 : vector<16x1xf32>
    %59 = arith.negf %58 : vector<16x1xf32>
    %60 = math.exp %59 : vector<16x1xf32>
    %cst_51 = arith.constant 1.000000e+00 : f32
    %61 = vector.broadcast %cst_51 : f32 to vector<16x1xf32>
    %62 = arith.addf %61, %60 : vector<16x1xf32>
    %63 = arith.divf %61, %62 : vector<16x1xf32>
    %c0_52 = arith.constant 0 : index
    %c0_53 = arith.constant 0 : index
    %64 = vector.load %arg16[%c0_52, %c0_53] : memref<16x1xf32, #tpu.memory_space<vmem>>, vector<16x1xf32>
    tpu.vector_store %arg16[%c0_52, %c0_53], %63 {strides = array<i32>} : memref<16x1xf32, #tpu.memory_space<vmem>>, vector<16x1xf32>,
    return
  }
  func.func @transform_0(%arg0: i32, %arg1: memref<1xi32, #tpu.memory_space<smem>>) -> (i32, i32, i32) {
    %c0_i32 = arith.constant 0 : i32
    %c0_i32_0 = arith.constant 0 : i32
    %c0_i32_1 = arith.constant 0 : i32
    return %c0_i32, %arg0, %c0_i32_0 : i32, i32, i32
  }
  func.func @transform_1(%arg0: i32, %arg1: memref<1xi32, #tpu.memory_space<smem>>) -> (i32, i32, i32) {
    %c0_i32 = arith.constant 0 : i32
    %c0_i32_0 = arith.constant 0 : i32
    %c0_i32_1 = arith.constant 0 : i32
    return %c0_i32, %arg0, %c0_i32_0 : i32, i32, i32
  }
  func.func @transform_2(%arg0: i32, %arg1: memref<1xi32, #tpu.memory_space<smem>>) -> (i32, i32) {
    %c0_i32 = arith.constant 0 : i32
    %c0_i32_0 = arith.constant 0 : i32
    return %arg0, %c0_i32 : i32, i32
  }
  func.func @transform_3(%arg0: i32, %arg1: memref<1xi32, #tpu.memory_space<smem>>) -> (i32, i32) {
    %c0_i32 = arith.constant 0 : i32
    %c0_i32_0 = arith.constant 0 : i32
    return %arg0, %c0_i32 : i32, i32
  }
  func.func @transform_4(%arg0: i32, %arg1: memref<1xi32, #tpu.memory_space<smem>>) -> (i32, i32) {
    %c0_i32 = arith.constant 0 : i32
    %c0_i32_0 = arith.constant 0 : i32
    %c0_i32_1 = arith.constant 0 : i32
    return %c0_i32, %c0_i32_0 : i32, i32
  }
  func.func @transform_5(%arg0: i32, %arg1: memref<1xi32, #tpu.memory_space<smem>>) -> (i32, i32) {
    %c0_i32 = arith.constant 0 : i32
    %c0_i32_0 = arith.constant 0 : i32
    %c0_i32_1 = arith.constant 0 : i32
    return %c0_i32, %c0_i32_0 : i32, i32
  }
  func.func @transform_6(%arg0: i32, %arg1: memref<1xi32, #tpu.memory_space<smem>>) -> (i32, i32) {
    %c0_i32 = arith.constant 0 : i32
    %c0_i32_0 = arith.constant 0 : i32
    %c0_i32_1 = arith.constant 0 : i32
    return %c0_i32, %c0_i32_0 : i32, i32
  }
  func.func @transform_7(%arg0: i32, %arg1: memref<1xi32, #tpu.memory_space<smem>>) -> (i32, i32) {
    %c0_i32 = arith.constant 0 : i32
    %c0_i32_0 = arith.constant 0 : i32
    %c0_i32_1 = arith.constant 0 : i32
    return %c0_i32, %c0_i32_0 : i32, i32
  }
  func.func @transform_8(%arg0: i32, %arg1: memref<1xi32, #tpu.memory_space<smem>>) -> (i32, i32) {
    %c0_i32 = arith.constant 0 : i32
    %c0_i32_0 = arith.constant 0 : i32
    %c0_i32_1 = arith.constant 0 : i32
    return %c0_i32, %c0_i32_0 : i32, i32
  }
  func.func @transform_9(%arg0: i32, %arg1: memref<1xi32, #tpu.memory_space<smem>>) -> (i32, i32) {
    %c0_i32 = arith.constant 0 : i32
    %c0_i32_0 = arith.constant 0 : i32
    %c0_i32_1 = arith.constant 0 : i32
    return %c0_i32, %c0_i32_0 : i32, i32
  }
  func.func @transform_10(%arg0: i32, %arg1: memref<1xi32, #tpu.memory_space<smem>>) -> (i32, i32) {
    %c0_i32 = arith.constant 0 : i32
    %c0_i32_0 = arith.constant 0 : i32
    %c0_i32_1 = arith.constant 0 : i32
    return %c0_i32, %c0_i32_0 : i32, i32
  }
  func.func @transform_11(%arg0: i32, %arg1: memref<1xi32, #tpu.memory_space<smem>>) -> (i32, i32) {
    %c0_i32 = arith.constant 0 : i32
    %c0_i32_0 = arith.constant 0 : i32
    %c0_i32_1 = arith.constant 0 : i32
    return %c0_i32, %c0_i32_0 : i32, i32
  }
  func.func @transform_12(%arg0: i32, %arg1: memref<1xi32, #tpu.memory_space<smem>>) -> (i32, i32) {
    %c0_i32 = arith.constant 0 : i32
    %c0_i32_0 = arith.constant 0 : i32
    %c0_i32_1 = arith.constant 0 : i32
    return %c0_i32, %c0_i32_0 : i32, i32
  }
  func.func @transform_13(%arg0: i32, %arg1: memref<1xi32, #tpu.memory_space<smem>>) -> (i32, i32) {
    %c0_i32 = arith.constant 0 : i32
    %c0_i32_0 = arith.constant 0 : i32
    %c0_i32_1 = arith.constant 0 : i32
    return %c0_i32, %c0_i32_0 : i32, i32
  }
  func.func @transform_14(%arg0: i32, %arg1: memref<1xi32, #tpu.memory_space<smem>>) -> (i32, i32) {
    %c0_i32 = arith.constant 0 : i32
    %c0_i32_0 = arith.constant 0 : i32
    return %arg0, %c0_i32 : i32, i32
  }
}

</mosaic_0001>

<bundles_post_ra>
// kernel: tpu_custom_call.1
= control target key start
LH: loop header
LB: loop body
LE: loop exit
PB: predicated region body
PF: predicated region fallthrough
CT: control target
= control target key end

     0   :  { %s3628_s0 = inlined_call_operand.<no memory space> [shape: s32[1], index: 0, kind: input, shape index: {}]   ;;  %s3629_s1 = inlined_call_operand.hbm [shape: bf16[8,16,128], index: 1, kind: input, shape index: {}]   ;;  %s3630_s2 = inlined_call_operand.hbm [shape: bf16[8,16,128], index: 2, kind: input, shape index: {}]   ;;  %s3631_s3 = inlined_call_operand.vmem [shape: s32[16,1], index: 3, kind: input, shape index: {}]   ;;  %s3632_s4 = inlined_call_operand.vmem [shape: s32[16,1], index: 4, kind: input, shape index: {}]   ;;  %s3633_s5 = inlined_call_operand.hbm [shape: bf16[128,384], index: 5, kind: input, shape index: {}]   ;;  %s3634_s6 = inlined_call_operand.hbm [shape: bf16[128,384], index: 6, kind: input, shape index: {}]   ;;  %s3635_s7 = inlined_call_operand.vmem [shape: f32[1,384], index: 7, kind: input, shape index: {}]   ;;  %s3636_s8 = inlined_call_operand.vmem [shape: f32[1,384], index: 8, kind: input, shape index: {}]   ;;  %s3637_s9 = inlined_call_operand.hbm [shape: bf16[128,384], index: 9, kind: input, shape index: {}]   ;;  %s3638_s10 = inlined_call_operand.hbm [shape: bf16[128,384], index: 10, kind: input, shape index: {}]   ;;  %s3639_s11 = inlined_call_operand.vmem [shape: f32[1,384], index: 11, kind: input, shape index: {}]   ;;  %s3640_s12 = inlined_call_operand.vmem [shape: f32[1,384], index: 12, kind: input, shape index: {}]   ;;  %s3641_s13 = inlined_call_operand.vmem [shape: f32[1,256], index: 13, kind: input, shape index: {}]   ;;  %s3642_s14 = inlined_call_operand.<no memory space> [shape: f32[1,1], index: 14, kind: input, shape index: {}]   ;;  %s3643_s15 = inlined_call_operand.vmem [shape: f32[16,1], index: 15, kind: output, shape index: {}]  }
   0x1   :  { %v21_v0 = vstv %s3642_s14 }
   0x2   :  { %22 = vst [vmem:[#allocation8] sm:$0x1] %v21_v0 }
   0x3   :  { %23 = vsyncpa [#allocation10], 0 }
   0x4   :  { %24 = vsyncpa [#allocation12], 0 }
   0x5   :  { %25 = vsyncpa [#allocation15], 0 }
   0x6   :  { %26 = vsyncpa [#allocation18], 0  ;;  %s2979_s20 = smov [#allocation11]  }
   0x7   :  { %s44_s21 = sshll.u32 %s2979_s20, 4  ;;  %s45_s21 = int_to_ptr.vmem [resolvable:$true] %s44_s21 }
   0x8   :  { %s2819_s22 = scalar_lea.vmem %s45_s21, 1024  ;;  %p2824_p1 = scmp.lt.s32.totalorder %s45_s21, %s45_s21 }
   0x9   :  { %p2820_p0 = scmp.ne.s32.totalorder %s45_s21, %s2819_s22  ;;  %p2825_p2 = scmp.lt.s32.totalorder %s2819_s22, %s2819_s22 }
   0xb   :  { %p2826_p3 = por %p2825_p2, %p2824_p1 }
   0xd   :  { %p2827_p4 = pnand %p2826_p3, %p2820_p0 }
   0xf   :  { %2830 = shalt.err (!%p2827_p4)
}
  0x10   :  { %s2980_s23 = smov 64   ;;  %s2981_s24 = smov 4  }
  0x11   :  { %50 = dma.hbm_to_vmem [thread:$0]  %s3630_s2, 1024, %s45_s21, [#allocation12], %s2980_s23, %s2980_s23, %s2981_s24  }
  0x12   :  { %s2982_s14 = smov [#allocation14]   ;;  %s2983_s28 = smov [#allocation9]  }
  0x13   :  { %s72_s27 = sshll.u32 %s2982_s14, 4  ;;  %s32_s29 = sshll.u32 %s2983_s28, 4  ;;  %s73_s27 = int_to_ptr.vmem [resolvable:$true] %s72_s27  ;;  %s33_s29 = int_to_ptr.vmem [resolvable:$true] %s32_s29 }
  0x14   :  { %s2839_s30 = scalar_lea.vmem %s73_s27, 3072  ;;  %p2844_p6 = scmp.lt.s32.totalorder %s73_s27, %s73_s27 }
  0x15   :  { %p2840_p5 = scmp.ne.s32.totalorder %s73_s27, %s2839_s30  ;;  %p2845_p7 = scmp.lt.s32.totalorder %s2839_s30, %s2839_s30 }
  0x17   :  { %p2846_p8 = por %p2845_p7, %p2844_p6 }
  0x19   :  { %p2847_p9 = pnand %p2846_p8, %p2840_p5 }
  0x1b   :  { %2850 = shalt.err (!%p2847_p9)
}
  0x1c   :  { %s2984_s16 = smov 192   ;;  %s2985_s17 = smov 12  }
  0x1d   :  { %78 = dma.hbm_to_vmem [thread:$0]  %s3634_s6, 3072, %s73_s27, [#allocation15], %s2984_s16, %s2984_s16, %s2985_s17  }
  0x1e   :  { %s2859_s2 = scalar_lea.vmem %s33_s29, 1024  ;;  %p2864_p11 = scmp.lt.s32.totalorder %s33_s29, %s33_s29 }
  0x1f   :  { %p2860_p10 = scmp.ne.s32.totalorder %s33_s29, %s2859_s2  ;;  %p2865_p12 = scmp.lt.s32.totalorder %s2859_s2, %s2859_s2 }
  0x21   :  { %p2866_p13 = por %p2865_p12, %p2864_p11 }
  0x23   :  { %p2867_p0 = pnand %p2866_p13, %p2860_p10 }
  0x25   :  { %2870 = shalt.err (!%p2867_p0)
}
  0x26   :  { %38 = dma.hbm_to_vmem [thread:$0]  %s3629_s1, 1024, %s33_s29, [#allocation10], %s2980_s23, %s2980_s23, %s2981_s24  }
  0x27   :  { %s2986_s22 = smov [#allocation13]   ;;  %s2987_s26 = smov [#allocation16]  }
  0x28   :  { %s60_s25 = sshll.u32 %s2986_s22, 4  ;;  %s88_s14 = sshll.u32 %s2987_s26, 4  ;;  %s61_s25 = int_to_ptr.vmem [resolvable:$true] %s60_s25  ;;  %s89_s14 = int_to_ptr.vmem [resolvable:$true] %s88_s14 }
  0x29   :  { %s2879_s28 = scalar_lea.vmem %s61_s25, 3072  ;;  %p2884_p2 = scmp.lt.s32.totalorder %s61_s25, %s61_s25 }
  0x2a   :  { %p2880_p1 = scmp.ne.s32.totalorder %s61_s25, %s2879_s28  ;;  %p2885_p3 = scmp.lt.s32.totalorder %s2879_s28, %s2879_s28 }
  0x2c   :  { %p2886_p4 = por %p2885_p3, %p2884_p2 }
  0x2e   :  { %p2887_p5 = pnand %p2886_p4, %p2880_p1 }
  0x30   :  { %2890 = shalt.err (!%p2887_p5)
}
  0x31   :  { %66 = dma.hbm_to_vmem [thread:$0]  %s3633_s5, 3072, %s61_s25, [#allocation12], %s2984_s16, %s2984_s16, %s2985_s17  }
  0x32   :  { %s2899_s1 = scalar_lea.vmem %s89_s14, 3072  ;;  %p2904_p7 = scmp.lt.s32.totalorder %s89_s14, %s89_s14 }
  0x33   :  { %p2900_p6 = scmp.ne.s32.totalorder %s89_s14, %s2899_s1  ;;  %p2905_p8 = scmp.lt.s32.totalorder %s2899_s1, %s2899_s1 }
  0x35   :  { %p2906_p9 = por %p2905_p8, %p2904_p7 }
  0x37   :  { %p2907_p10 = pnand %p2906_p9, %p2900_p6 }
  0x39   :  { %2910 = shalt.err (!%p2907_p10)
}
  0x3a   :  { %94 = dma.hbm_to_vmem [thread:$0]  %s3637_s9, 3072, %s89_s14, [#allocation15], %s2984_s16, %s2984_s16, %s2985_s17  }
  0x3b   :  { %s2988_s29 = smov [#allocation17]  }
  0x3c   :  { %s100_s30 = sshll.u32 %s2988_s29, 4  ;;  %s101_s30 = int_to_ptr.vmem [resolvable:$true] %s100_s30 }
  0x3d   :  { %s2919_s18 = scalar_lea.vmem %s101_s30, 3072  ;;  %p2924_p12 = scmp.lt.s32.totalorder %s101_s30, %s101_s30 }
  0x3e   :  { %p2920_p11 = scmp.ne.s32.totalorder %s101_s30, %s2919_s18  ;;  %p2925_p13 = scmp.lt.s32.totalorder %s2919_s18, %s2919_s18 }
  0x40   :  { %p2926_p0 = por %p2925_p13, %p2924_p12 }
  0x42   :  { %p2927_p1 = pnand %p2926_p0, %p2920_p11 }
  0x44   :  { %2930 = shalt.err (!%p2927_p1)
}
  0x45   :  { %106 = dma.hbm_to_vmem [thread:$0]  %s3638_s10, 3072, %s101_s30, [#allocation18], %s2984_s16, %s2984_s16, %s2985_s17  }
  0x46   :  { %2951 = dma.done.wait [#allocation10], 1024  }
  0x47   :  { %2952 = vsyncadd [#allocation10], 4294966272 }
  0x48   :  { %2953 = dma.done.wait [#allocation12], 4096  }
  0x49   :  { %2954 = vsyncadd [#allocation12], 4294963200 }
  0x4a   :  { %2955 = dma.done.wait [#allocation15], 6144  }
  0x4b   :  { %2956 = vsyncadd [#allocation15], 4294961152 }
  0x4c   :  { %2957 = dma.done.wait [#allocation18], 3072  }
  0x4d   :  { %2958 = vsyncadd [#allocation18], 4294964224  ;;  %v2989_v1 = vmov 0.0   ;;  %v3644_v2 = vmov 0   ;;  %v3108_v3 = vld [vmem:[#allocation14] sm:$0xff]  ;;  %v3112_v5 = vld [vmem:[#allocation14 + $0xc] sm:$0xff] }
  0x4e   :  { %1520 = vst [vmem:[#allocation4] sm:$0xff] %v2989_v1  ;;  %1521 = vst [vmem:[#allocation4 + $0x8] sm:$0xff] %v2989_v1  ;;  %540 = vmatprep.mubr.bf16.mxu0 %v3644_v2  ;;  %v3110_v4 = vld [vmem:[#allocation14 + $0x8] sm:$0xf]  ;;  %v3114_v6 = vld [vmem:[#allocation14 + $0x14] sm:$0xf] }
  0x4f   :  { %1522 = vst [vmem:[#allocation5 + $0x8] sm:$0xff] %v2989_v1  ;;  %1523 = vst [vmem:[#allocation5] sm:$0xff] %v2989_v1  ;;  %v3116_v7 = vld [vmem:[#allocation14 + $0x18] sm:$0xff]  ;;  %v3118_v8 = vld [vmem:[#allocation14 + $0x20] sm:$0xf]  ;;  %p2342_p2 = scmp.le.s32.totalorder %s3628_s0, 0 }
  0x50   :  { %3674 = vst [vmem:[#allocation23_spill] sm:$0xff] %v3108_v3  ;;  %3675 = vst [vmem:[#allocation24_spill] sm:$0xff] %v3110_v4  ;;  %v3120_v9 = vld [vmem:[#allocation14 + $0x24] sm:$0xff]  ;;  %v3122_v10 = vld [vmem:[#allocation14 + $0x2c] sm:$0xf]  ;;  %s3430_s24 = smov (!%p2342_p2), 0  }
  0x51   :  { %3676 = vst [vmem:[#allocation25_spill] sm:$0xff] %v3112_v5  ;;  %3677 = vst [vmem:[#allocation26_spill] sm:$0xff] %v3114_v6  ;;  %v3124_v11 = vld [vmem:[#allocation14 + $0x30] sm:$0xff]  ;;  %v3126_v12 = vld [vmem:[#allocation14 + $0x38] sm:$0xf] }
  0x52   :  { %3678 = vst [vmem:[#allocation27_spill] sm:$0xff] %v3116_v7  ;;  %3679 = vst [vmem:[#allocation28_spill] sm:$0xff] %v3118_v8  ;;  %v3128_v13 = vld [vmem:[#allocation14 + $0x3c] sm:$0xff]  ;;  %v3130_v14 = vld [vmem:[#allocation14 + $0x44] sm:$0xf] }
  0x53   :  { %3680 = vst [vmem:[#allocation29_spill] sm:$0xff] %v3120_v9  ;;  %3681 = vst [vmem:[#allocation30_spill] sm:$0xff] %v3122_v10  ;;  %v3132_v15 = vld [vmem:[#allocation14 + $0x48] sm:$0xff]  ;;  %v3134_v16 = vld [vmem:[#allocation14 + $0x50] sm:$0xf] }
  0x54   :  { %3682 = vst [vmem:[#allocation31_spill] sm:$0xff] %v3124_v11  ;;  %3683 = vst [vmem:[#allocation32_spill] sm:$0xff] %v3126_v12  ;;  %v3136_v17 = vld [vmem:[#allocation14 + $0x54] sm:$0xff]  ;;  %v3138_v18 = vld [vmem:[#allocation14 + $0x5c] sm:$0xf] }
  0x55   :  { %3684 = vst [vmem:[#allocation33_spill] sm:$0xff] %v3128_v13  ;;  %3685 = vst [vmem:[#allocation34_spill] sm:$0xff] %v3130_v14  ;;  %v3140_v19 = vld [vmem:[#allocation14 + $0x60] sm:$0xff]  ;;  %v3142_v20 = vld [vmem:[#allocation14 + $0x68] sm:$0xf] }
  0x56   :  { %3686 = vst [vmem:[#allocation35_spill] sm:$0xff] %v3132_v15  ;;  %3687 = vst [vmem:[#allocation36_spill] sm:$0xff] %v3134_v16  ;;  %v3144_v21 = vld [vmem:[#allocation14 + $0x6c] sm:$0xff]  ;;  %v3146_v22 = vld [vmem:[#allocation14 + $0x74] sm:$0xf] }
  0x57   :  { %3688 = vst [vmem:[#allocation37_spill] sm:$0xff] %v3136_v17  ;;  %3689 = vst [vmem:[#allocation38_spill] sm:$0xff] %v3138_v18  ;;  %v3148_v23 = vld [vmem:[#allocation14 + $0x78] sm:$0xff]  ;;  %v3150_v24 = vld [vmem:[#allocation14 + $0x80] sm:$0xf] }
  0x58   :  { %3690 = vst [vmem:[#allocation39_spill] sm:$0xff] %v3140_v19  ;;  %3691 = vst [vmem:[#allocation40_spill] sm:$0xff] %v3142_v20  ;;  %v3152_v25 = vld [vmem:[#allocation14 + $0x84] sm:$0xff]  ;;  %v3154_v26 = vld [vmem:[#allocation14 + $0x8c] sm:$0xf] }
  0x59   :  { %3692 = vst [vmem:[#allocation41_spill] sm:$0xff] %v3144_v21  ;;  %3693 = vst [vmem:[#allocation42_spill] sm:$0xff] %v3146_v22  ;;  %v3156_v27 = vld [vmem:[#allocation14 + $0x90] sm:$0xff]  ;;  %v3158_v28 = vld [vmem:[#allocation14 + $0x98] sm:$0xf] }
  0x5a   :  { %v3160_v29 = vld [vmem:[#allocation14 + $0x9c] sm:$0xff]  ;;  %v3162_v30 = vld [vmem:[#allocation14 + $0xa4] sm:$0xf]  ;;  %v3164_v31 = vld [vmem:[#allocation14 + $0xa8] sm:$0xff] }
  0x5b   :  { %v3166_v32 = vld [vmem:[#allocation14 + $0xb0] sm:$0xf]  ;;  %v3168_v33 = vld [vmem:[#allocation14 + $0xb4] sm:$0xff]  ;;  %v3170_v34 = vld [vmem:[#allocation14 + $0xbc] sm:$0xf] }
  0x5c   :  { %v3172_v35 = vld [vmem:[#allocation17] sm:$0xff]  ;;  %v3174_v36 = vld [vmem:[#allocation17 + $0x8] sm:$0xf]  ;;  %v3176_v37 = vld [vmem:[#allocation17 + $0xc] sm:$0xff] }
  0x5d   :  { %3694 = vst [vmem:[#allocation43_spill] sm:$0xff] %v3172_v35  ;;  %3695 = vst [vmem:[#allocation44_spill] sm:$0xff] %v3174_v36  ;;  %v3178_v38 = vld [vmem:[#allocation17 + $0x14] sm:$0xf]  ;;  %v3180_v39 = vld [vmem:[#allocation17 + $0x18] sm:$0xff] }
  0x5e   :  { %3696 = vst [vmem:[#allocation45_spill] sm:$0xff] %v3176_v37  ;;  %3697 = vst [vmem:[#allocation46_spill] sm:$0xff] %v3178_v38  ;;  %v3182_v40 = vld [vmem:[#allocation17 + $0x20] sm:$0xf]  ;;  %v3184_v41 = vld [vmem:[#allocation17 + $0x24] sm:$0xff] }
  0x5f   :  { %3698 = vst [vmem:[#allocation47_spill] sm:$0xff] %v3180_v39  ;;  %3699 = vst [vmem:[#allocation48_spill] sm:$0xff] %v3182_v40  ;;  %v3186_v42 = vld [vmem:[#allocation17 + $0x2c] sm:$0xf]  ;;  %v3188_v43 = vld [vmem:[#allocation17 + $0x30] sm:$0xff] }
  0x60   :  { %3700 = vst [vmem:[#allocation49_spill] sm:$0xff] %v3184_v41  ;;  %3701 = vst [vmem:[#allocation50_spill] sm:$0xff] %v3186_v42  ;;  %v3190_v44 = vld [vmem:[#allocation17 + $0x38] sm:$0xf]  ;;  %v3192_v45 = vld [vmem:[#allocation17 + $0x3c] sm:$0xff] }
  0x61   :  { %3702 = vst [vmem:[#allocation51_spill] sm:$0xff] %v3188_v43  ;;  %3703 = vst [vmem:[#allocation52_spill] sm:$0xff] %v3190_v44  ;;  %v3194_v46 = vld [vmem:[#allocation17 + $0x44] sm:$0xf]  ;;  %v3196_v47 = vld [vmem:[#allocation17 + $0x48] sm:$0xff] }
  0x62   :  { %3704 = vst [vmem:[#allocation53_spill] sm:$0xff] %v3192_v45  ;;  %3705 = vst [vmem:[#allocation54_spill] sm:$0xff] %v3194_v46  ;;  %v3198_v48 = vld [vmem:[#allocation17 + $0x50] sm:$0xf]  ;;  %v3200_v49 = vld [vmem:[#allocation17 + $0x54] sm:$0xff] }
  0x63   :  { %3706 = vst [vmem:[#allocation55_spill] sm:$0xff] %v3196_v47  ;;  %3707 = vst [vmem:[#allocation56_spill] sm:$0xff] %v3198_v48  ;;  %v3202_v50 = vld [vmem:[#allocation17 + $0x5c] sm:$0xf]  ;;  %v3204_v51 = vld [vmem:[#allocation17 + $0x60] sm:$0xff] }
  0x64   :  { %3708 = vst [vmem:[#allocation57_spill] sm:$0xff] %v3200_v49  ;;  %3709 = vst [vmem:[#allocation58_spill] sm:$0xff] %v3202_v50  ;;  %v3206_v52 = vld [vmem:[#allocation17 + $0x68] sm:$0xf]  ;;  %v3208_v53 = vld [vmem:[#allocation17 + $0x6c] sm:$0xff] }
  0x65   :  { %3710 = vst [vmem:[#allocation59_spill] sm:$0xff] %v3204_v51  ;;  %3711 = vst [vmem:[#allocation60_spill] sm:$0xff] %v3206_v52  ;;  %v3210_v54 = vld [vmem:[#allocation17 + $0x74] sm:$0xf]  ;;  %v3212_v55 = vld [vmem:[#allocation17 + $0x78] sm:$0xff] }
  0x66   :  { %3712 = vst [vmem:[#allocation61_spill] sm:$0xff] %v3208_v53  ;;  %3713 = vst [vmem:[#allocation62_spill] sm:$0xff] %v3210_v54  ;;  %v3214_v56 = vld [vmem:[#allocation17 + $0x80] sm:$0xf]  ;;  %v3216_v57 = vld [vmem:[#allocation17 + $0x84] sm:$0xff] }
  0x67   :  { %3714 = vst [vmem:[#allocation63_spill] sm:$0xff] %v3212_v55  ;;  %3715 = vst [vmem:[#allocation64_spill] sm:$0xff] %v3214_v56  ;;  %v3218_v58 = vld [vmem:[#allocation17 + $0x8c] sm:$0xf]  ;;  %v3220_v59 = vld [vmem:[#allocation17 + $0x90] sm:$0xff] }
  0x68   :  { %3716 = vst [vmem:[#allocation65_spill] sm:$0xff] %v3216_v57  ;;  %3717 = vst [vmem:[#allocation66_spill] sm:$0xff] %v3218_v58  ;;  %v3222_v60 = vld [vmem:[#allocation17 + $0x98] sm:$0xf]  ;;  %v3224_v61 = vld [vmem:[#allocation17 + $0x9c] sm:$0xff] }
  0x69   :  { %3718 = vst [vmem:[#allocation67_spill] sm:$0xff] %v3220_v59  ;;  %3719 = vst [vmem:[#allocation68_spill] sm:$0xff] %v3222_v60  ;;  %v3226_v62 = vld [vmem:[#allocation17 + $0xa4] sm:$0xf]  ;;  %v3228_v63 = vld [vmem:[#allocation17 + $0xa8] sm:$0xff] }
  0x6a   :  { %3720 = vst [vmem:[#allocation69_spill] sm:$0xff] %v3226_v62  ;;  %v3230_v0 = vld [vmem:[#allocation17 + $0xb0] sm:$0xf]  ;;  %v3232_v1 = vld [vmem:[#allocation17 + $0xb4] sm:$0xff]  ;;  %v3234_v2 = vld [vmem:[#allocation17 + $0xbc] sm:$0xf] }
  0x6b   :  { %3721 = vst [vmem:[#allocation70_spill] sm:$0xff] %v3230_v0  ;;  %3722 = vst [vmem:[#allocation71_spill] sm:$0xff] %v3232_v1  ;;  %v3239_v36 = vld [vmem:[%s3636_s8 + $0x2] ss:$0 sm:$0xff]  ;;  %v3254_v42 = vld [vmem:[%s3631_s3 + $0x8] sm:$0xff] }
  0x6c   :  { %3723 = vst [vmem:[#allocation72_spill] sm:$0xff] %v3234_v2  ;;  %3724 = vst [vmem:[#allocation73_spill] sm:$0xff] %v3239_v36  ;;  %v3244_v38 = vld [vmem:[%s3640_s12 + $0x2] ss:$0 sm:$0xff]  ;;  %v3264_v36 = vld [vmem:[%s3632_s4 + $0x8] sm:$0xff] }
  0x6d   :  { %3725 = vst [vmem:[#allocation74_spill] sm:$0xff] %v3244_v38  ;;  %v3249_v40 = vld [vmem:[%s3631_s3] sm:$0xff]  ;;  %v2681_v38 = vld [vmem:[#allocation13 + $0xac] ss:$12 sps:$4 sm:$0xff]   ;;  %v2684_v44 = vld [vmem:[#allocation13 + $0xa8] ss:$12 sps:$4 sm:$0xff]  }
  0x6e   :  { %v3259_v35 = vld [vmem:[%s3632_s4] sm:$0xff]  ;;  %508 = vmatprep.subr.bf16.mxu0 %v2681_v38  ;;  %v2695_v52 = vld [vmem:[#allocation13 + $0x68] ss:$12 sps:$4 sm:$0xff]   ;;  %v2697_v38 = vld [vmem:[#allocation13 + $0x4c] ss:$12 sps:$4 sm:$0xff]  }
  0x6f   :  { %v2683_v37 = vld [vmem:[#allocation13 + $0xb0] ss:$12 sps:$4 sm:$0xff]   ;;  %v2685_v46 = vld [vmem:[#allocation13 + $0x94] ss:$12 sps:$4 sm:$0xff]   ;;  %509 = vmatpush1.bf16.msra.mxu0 %v2684_v44  ;;  %v2687_v39 = vld [vmem:[#allocation13 + $0x98] ss:$12 sps:$4 sm:$0xff]  }
  0x70   :  { %2522 = vmatprep.subr.bf16.mxu1 %v2683_v37  ;;  %v2688_v41 = vld [vmem:[#allocation13 + $0x90] ss:$12 sps:$4 sm:$0xff]   ;;  %510 = vmatprep.subr.bf16.mxu0 %v2685_v46  ;;  %v2691_v50 = vld [vmem:[#allocation13 + $0x80] ss:$12 sps:$4 sm:$0xff]   ;;  %v2692_v43 = vld [vmem:[#allocation13 + $0x78] ss:$12 sps:$4 sm:$0xff]  }
  0x71   :  { %2523 = vmatpush3.bf16.msra.mxu1 %v2683_v37  ;;  %v2689_v48 = vld [vmem:[#allocation13 + $0x7c] ss:$12 sps:$4 sm:$0xff]   ;;  %v2693_v45 = vld [vmem:[#allocation13 + $0x64] ss:$12 sps:$4 sm:$0xff]   ;;  %v2696_v54 = vld [vmem:[#allocation13 + $0x60] ss:$12 sps:$4 sm:$0xff]  }
  0x72   :  { %2524 = vmatprep.subr.bf16.mxu1 %v2687_v39  ;;  %v2699_v44 = vld [vmem:[#allocation13 + $0x50] ss:$12 sps:$4 sm:$0xff]   ;;  %v2700_v37 = vld [vmem:[#allocation13 + $0x48] ss:$12 sps:$4 sm:$0xff]   ;;  %v2713_v47 = vld [vmem:[#allocation9] sm:$0xff]  }
  0x73   :  { %511 = vmatpush1.bf16.msra.mxu0 %v2688_v41  ;;  %v2701_v46 = vld [vmem:[#allocation13 + $0x34] ss:$12 sps:$4 sm:$0xff]   ;;  %v2703_v41 = vld [vmem:[#allocation13 + $0x38] ss:$12 sps:$4 sm:$0xff]   ;;  %2538 = vmatprep.mubr.bf16.mxu1 %v2713_v47 }
  0x74   :  { %512 = vmatprep.subr.bf16.mxu0 %v2689_v48  ;;  %v2705_v48 = vld [vmem:[#allocation13 + $0x1c] ss:$12 sps:$4 sm:$0xff]   ;;  %v2721_v49 = vld [vmem:[#allocation16 + $0x94] ss:$12 sps:$4 sm:$0xff]  }
  0x75   :  { %2525 = vmatpush3.bf16.msra.mxu1 %v2687_v39  ;;  %v2704_v39 = vld [vmem:[#allocation13 + $0x30] ss:$12 sps:$4 sm:$0xff]   ;;  %v2731_v56 = vld [vmem:[#allocation9 + $0x20] sm:$0xff]  }
  0x76   :  { %2526 = vmatprep.subr.bf16.mxu1 %v2691_v50  ;;  %v2740_v58 = vld [vmem:[#allocation9 + $0x30] sm:$0xff]   ;;  %v2741_v51 = vld [vmem:[#allocation9 + $0x38] sm:$0xff]  }
  0x77   :  { %513 = vmatpush1.bf16.msra.mxu0 %v2692_v43  ;;  %v2707_v43 = vld [vmem:[#allocation13 + $0x20] ss:$12 sps:$4 sm:$0xff]  }
  0x78   :  { %514 = vmatprep.subr.bf16.mxu0 %v2693_v45  ;;  %v2708_v45 = vld [vmem:[#allocation13 + $0x18] ss:$12 sps:$4 sm:$0xff]  }
  0x79   :  { %2527 = vmatpush3.bf16.msra.mxu1 %v2691_v50  ;;  %v2709_v50 = vld [vmem:[#allocation13 + $0x4] ss:$12 sps:$4 sm:$0xff]  }
  0x7a   :  { %2528 = vmatprep.subr.bf16.mxu1 %v2695_v52 }
  0x7b   :  { %515 = vmatpush1.bf16.msra.mxu0 %v2696_v54  ;;  %v2712_v54 = vld [vmem:[#allocation13] ss:$12 sps:$4 sm:$0xff]  }
  0x7c   :  { %516 = vmatprep.subr.bf16.mxu0 %v2697_v38  ;;  %v2718_v38 = vld [vmem:[#allocation16 + $0xb0] ss:$12 sps:$4 sm:$0xff]  }
  0x7d   :  { %2529 = vmatpush3.bf16.msra.mxu1 %v2695_v52  ;;  %v2711_v52 = vld [vmem:[#allocation13 + $0x8] ss:$12 sps:$4 sm:$0xff]  }
  0x7e   :  { %2530 = vmatprep.subr.bf16.mxu1 %v2699_v44 }
  0x7f   :  { %517 = vmatpush1.bf16.msra.mxu0 %v2700_v37  ;;  %v2717_v37 = vld [vmem:[#allocation16 + $0xac] ss:$12 sps:$4 sm:$0xff]  }
  0x80   :  { %518 = vmatprep.subr.bf16.mxu0 %v2701_v46  ;;  %v2715_v46 = vld [vmem:[#allocation16 + $0xa8] ss:$12 sps:$4 sm:$0xff]  }
  0x81   :  { %2531 = vmatpush3.bf16.msra.mxu1 %v2699_v44  ;;  %v2714_v44 = vld [vmem:[#allocation9 + $0x8] sm:$0xff]  }
  0x82   :  { %2532 = vmatprep.subr.bf16.mxu1 %v2703_v41 }
  0x83   :  { %519 = vmatpush1.bf16.msra.mxu0 %v2704_v39  ;;  %v2722_v39 = vld [vmem:[#allocation9 + $0x10] sm:$0xff]  }
  0x84   :  { %520 = vmatprep.subr.bf16.mxu0 %v2705_v48  ;;  %v2719_v48 = vld [vmem:[#allocation16 + $0x90] ss:$12 sps:$4 sm:$0xff]  }
  0x85   :  { %2533 = vmatpush3.bf16.msra.mxu1 %v2703_v41  ;;  %v2727_v41 = vld [vmem:[#allocation16 + $0x98] ss:$12 sps:$4 sm:$0xff]  }
  0x86   :  { %2534 = vmatprep.subr.bf16.mxu1 %v2707_v43 }
  0x87   :  { %521 = vmatpush1.bf16.msra.mxu0 %v2708_v45  ;;  %v3726_v45 = vmov 0  }
  0x88   :  { %522 = vmatprep.subr.bf16.mxu0 %v2709_v50  ;;  %v2726_v50 = vld [vmem:[#allocation16 + $0x7c] ss:$12 sps:$4 sm:$0xff]  }
  0x89   :  { %2535 = vmatpush3.bf16.msra.mxu1 %v2707_v43  ;;  %v2736_v43 = vld [vmem:[#allocation16 + $0x80] ss:$12 sps:$4 sm:$0xff]  }
  0x8a   :  { %2536 = vmatprep.subr.bf16.mxu1 %v2711_v52 }
  0x8b   :  { %523 = vmatpush1.bf16.msra.mxu0 %v2712_v54  ;;  %v2723_v54 = vld [vmem:[#allocation9 + $0x18] sm:$0xff]  }
  0x8c   :  { %2554 = vmatprep.subr.bf16.mxu0 %v2718_v38 }
  0x8d   :  { %2537 = vmatpush3.bf16.msra.mxu1 %v2711_v52  ;;  %v2724_v52 = vld [vmem:[#allocation16 + $0x78] ss:$12 sps:$4 sm:$0xff]  }
  0x8e   :  { %1114 = vmatprep.subr.bf16.mxu1 %v2717_v37  ;;  %541 = vmatmul.mubr.bf16.vlgmr.msra.gmra.mxu0 %v2713_v47  ;;  %v2730_v47 = vld [vmem:[#allocation16 + $0x64] ss:$12 sps:$4 sm:$0xff]   ;;  %v2745_v37 = vld [vmem:[#allocation16 + $0x68] ss:$12 sps:$4 sm:$0xff]  }
  0x8f   :  { %2555 = vmatpush3.bf16.msra.mxu0 %v2718_v38  ;;  %550 = vmatprep.mubr.bf16.mxu0 %v3726_v45  ;;  %v2728_v38 = vld [vmem:[#allocation16 + $0x60] ss:$12 sps:$4 sm:$0xff]  }
  0x90   :  { %2539 = vmatmul.mubr.bf16.vlgmr.msra.gmra.mxu1 %v2714_v44  ;;  %2556 = vmatprep.subr.bf16.mxu0 %v2727_v41 }
  0x91   :  { %1115 = vmatpush1.bf16.msra.mxu1 %v2715_v46  ;;  %2542 = vmatprep.mubr.bf16.mxu1 %v2722_v39  ;;  %v2735_v46 = vld [vmem:[#allocation16 + $0x4c] ss:$12 sps:$4 sm:$0xff]  }
  0x92   :  { %1116 = vmatprep.subr.bf16.mxu1 %v2721_v49  ;;  %v2732_v49 = vld [vmem:[#allocation9 + $0x28] sm:$0xff]  }
  0x93   :  { %2557 = vmatpush3.bf16.msra.mxu0 %v2727_v41  ;;  %v2750_v41 = vld [vmem:[#allocation16 + $0x50] ss:$12 sps:$4 sm:$0xff]  }
  0x94   :  { %2558 = vmatprep.subr.bf16.mxu0 %v2736_v43 }
  0x95   :  { %1117 = vmatpush1.bf16.msra.mxu1 %v2719_v48  ;;  %v2733_v48 = vld [vmem:[#allocation16 + $0x48] ss:$12 sps:$4 sm:$0xff]  }
  0x96   :  { %1118 = vmatprep.subr.bf16.mxu1 %v2726_v50  ;;  %551 = vmatmul.mubr.bf16.gmra.mxu0 %v2714_v44  ;;  %v2739_v50 = vld [vmem:[#allocation16 + $0x34] ss:$12 sps:$4 sm:$0xff]   ;;  %v2752_v44 = vld [vmem:[#allocation16 + $0x38] ss:$12 sps:$4 sm:$0xff]  }
  0x97   :  { %560 = vmatprep.mubr.bf16.mxu0 %v3726_v45  ;;  %2559 = vmatpush3.bf16.msra.mxu0 %v2736_v43  ;;  %v2754_v43 = vld [vmem:[#allocation16 + $0x20] ss:$12 sps:$4 sm:$0xff]  }
  0x98   :  { %2543 = vmatmul.mubr.bf16.gmra.mxu1 %v2723_v54  ;;  %2560 = vmatprep.subr.bf16.mxu0 %v2745_v37 }
  0x99   :  { %1119 = vmatpush1.bf16.msra.mxu1 %v2724_v52  ;;  %2546 = vmatprep.mubr.bf16.mxu1 %v2731_v56  ;;  %v2737_v52 = vld [vmem:[#allocation16 + $0x30] ss:$12 sps:$4 sm:$0xff]  }
  0x9a   :  { %1120 = vmatprep.subr.bf16.mxu1 %v2730_v47  ;;  %v2744_v47 = vld [vmem:[#allocation16 + $0x1c] ss:$12 sps:$4 sm:$0xff]  }
  0x9b   :  { %2561 = vmatpush3.bf16.msra.mxu0 %v2745_v37  ;;  %v2746_v37 = vld [vmem:[#allocation16] ss:$12 sps:$4 sm:$0xff]  }
  0x9c   :  { %2562 = vmatprep.subr.bf16.mxu0 %v2750_v41 }
  0x9d   :  { %1121 = vmatpush1.bf16.msra.mxu1 %v2728_v38  ;;  %v2742_v38 = vld [vmem:[#allocation16 + $0x18] ss:$12 sps:$4 sm:$0xff]  }
  0x9e   :  { %1122 = vmatprep.subr.bf16.mxu1 %v2735_v46  ;;  %561 = vmatmul.mubr.bf16.gmra.mxu0 %v2722_v39  ;;  %v2748_v46 = vld [vmem:[#allocation16 + $0x4] ss:$12 sps:$4 sm:$0xff]   ;;  %v2756_v39 = vld [vmem:[#allocation16 + $0x8] ss:$12 sps:$4 sm:$0xff]  }
  0x9f   :  { %570 = vmatprep.mubr.bf16.mxu0 %v3726_v45  ;;  %2563 = vmatpush3.bf16.msra.mxu0 %v2750_v41  ;;  %v2749_v41 = vld [vmem:[#allocation11] sm:$0xff]  }
  0xa0   :  { %2547 = vmatmul.mubr.bf16.gmra.mxu1 %v2732_v49  ;;  %2564 = vmatprep.subr.bf16.mxu0 %v2752_v44 }
  0xa1   :  { %1123 = vmatpush1.bf16.msra.mxu1 %v2733_v48  ;;  %2550 = vmatprep.mubr.bf16.mxu1 %v2740_v58  ;;  %v2753_v48 = vld [vmem:[#allocation11 + $0x10] sm:$0xff]  }
  0xa2   :  { %1124 = vmatprep.subr.bf16.mxu1 %v2739_v50  ;;  %v2757_v50 = vld [vmem:[#allocation11 + $0x20] sm:$0xff]  }
  0xa3   :  { %2565 = vmatpush3.bf16.msra.mxu0 %v2752_v44  ;;  %v266_v44 = vlaneseq }
  0xa4   :  { %2566 = vmatprep.subr.bf16.mxu0 %v2754_v43 }
  0xa5   :  { %1125 = vmatpush1.bf16.msra.mxu1 %v2737_v52  ;;  %v267_v52 = vshrl.u32 %v266_v44, 7 }
  0xa6   :  { %1126 = vmatprep.subr.bf16.mxu1 %v2744_v47  ;;  %571 = vmatmul.mubr.bf16.gmra.mxu0 %v2723_v54  ;;  %v2751_v54 = vld [vmem:[#allocation11 + $0x8] sm:$0xff]  }
  0xa7   :  { %580 = vmatprep.mubr.bf16.mxu0 %v3726_v45  ;;  %2567 = vmatpush3.bf16.msra.mxu0 %v2754_v43  ;;  %v279_v47 = vsub.s32 2, %v267_v52  ;;  %v3284_v43 = vld [vmem:[%s3639_s11] sm:$0x7] }
  0xa8   :  { %2551 = vmatmul.mubr.bf16.gmra.mxu1 %v2741_v51  ;;  %2568 = vmatprep.subr.bf16.mxu0 %v2756_v39 }
  0xa9   :  { %1127 = vmatpush1.bf16.msra.mxu1 %v2742_v38  ;;  %1146 = vmatprep.mubr.bf16.mxu1 %v3726_v45  ;;  %v3286_v38 = vsub.s32 0, %v267_v52 }
  0xaa   :  { %1128 = vmatprep.subr.bf16.mxu1 %v2748_v46  ;;  %v300_v46 = vrot.slane %v3284_v43, %v279_v47 }
  0xab   :  { %2569 = vmatpush3.bf16.msra.mxu0 %v2756_v39 }
  0xac   :  { %v3290_v39 = vrot.slane %v300_v46, %v3286_v38 }
  0xad   :  { %1129 = vmatpush1.bf16.msra.mxu1 %v2746_v37  ;;  %v263_v37 = vld [vmem:[%s3636_s8] sm:$0x7] }
  0xae   :  { %581 = vmatmul.mubr.bf16.gmra.mxu0 %v2731_v56  ;;  %v2755_v56 = vld [vmem:[#allocation11 + $0x18] sm:$0xff]  }
  0xaf   :  { %590 = vmatprep.mubr.bf16.mxu0 %v3726_v45 }
  0xb0   :  { %1147 = vmatmul.mubr.bf16.vlgmr.msra.gmra.mxu1 %v2749_v41 }
  0xb1   :  { %1156 = vmatprep.mubr.bf16.mxu1 %v3726_v45 }
  0xb6   :  { %591 = vmatmul.mubr.bf16.gmra.mxu0 %v2732_v49  ;;  %v2758_v49 = vld [vmem:[#allocation11 + $0x28] sm:$0xff]  }
  0xb7   :  { %600 = vmatprep.mubr.bf16.mxu0 %v3726_v45 }
  0xb8   :  { %1157 = vmatmul.mubr.bf16.gmra.mxu1 %v2751_v54 }
  0xb9   :  { %1166 = vmatprep.mubr.bf16.mxu1 %v3726_v45 }
  0xbe   :  { %601 = vmatmul.mubr.bf16.gmra.mxu0 %v2740_v58  ;;  %v2759_v58 = vld [vmem:[#allocation11 + $0x30] sm:$0xff]  }
  0xbf   :  { %610 = vmatprep.mubr.bf16.mxu0 %v3726_v45 }
  0xc0   :  { %1167 = vmatmul.mubr.bf16.gmra.mxu1 %v2753_v48 }
  0xc1   :  { %1176 = vmatprep.mubr.bf16.mxu1 %v3726_v45 }
  0xc6   :  { %611 = vmatmul.mubr.bf16.gmra.mxu0 %v2741_v51  ;;  %v2760_v51 = vld [vmem:[#allocation11 + $0x38] sm:$0xff]  }
  0xc7   :  { %2570 = vmatprep.mubr.bf16.mxu0 %v2749_v41 }
  0xc8   :  { %1177 = vmatmul.mubr.bf16.gmra.mxu1 %v2755_v56 }
  0xc9   :  { %1186 = vmatprep.mubr.bf16.mxu1 %v3726_v45 }
  0xce   :  { %2571 = vmatmul.mubr.bf16.vlgmr.msra.gmra.mxu0 %v2751_v54  ;;  %v3298_v54 = vsub.s32 1, %v267_v52 }
  0xcf   :  { %2574 = vmatprep.mubr.bf16.mxu0 %v2753_v48 }
  0xd0   :  { %1187 = vmatmul.mubr.bf16.gmra.mxu1 %v2757_v50  ;;  %3727 = vst [vmem:[#allocation75_spill] sm:$0xff] %v3298_v54 }
  0xd1   :  { %1196 = vmatprep.mubr.bf16.mxu1 %v3726_v45 }
  0xd6   :  { %2575 = vmatmul.mubr.bf16.gmra.mxu0 %v2755_v56 }
  0xd7   :  { %2578 = vmatprep.mubr.bf16.mxu0 %v2757_v50 }
  0xd8   :  { %1197 = vmatmul.mubr.bf16.gmra.mxu1 %v2758_v49 }
  0xd9   :  { %1206 = vmatprep.mubr.bf16.mxu1 %v3726_v45 }
  0xde   :  { %2579 = vmatmul.mubr.bf16.gmra.mxu0 %v2758_v49 }
  0xdf   :  { %2582 = vmatprep.mubr.bf16.mxu0 %v2759_v58 }
  0xe0   :  { %1207 = vmatmul.mubr.bf16.gmra.mxu1 %v2759_v58 }
  0xe1   :  { %1216 = vmatprep.mubr.bf16.mxu1 %v3726_v45  ;;  %v262_v45 = vld [vmem:[%s3635_s7] sm:$0x7] }
  0xe2   :  { %v264_v41 = vadd.f32 %v263_v37, %v262_v45  ;;  %v280_v48 = vrot.slane %v262_v45, %v279_v47 }
  0xe4   :  { %v269_v56 = vrot.slane %v264_v41, %v3286_v38  ;;  %v273_v50 = vrot.slane %v264_v41, %v3298_v54  ;;  %v3303_v49 = vrot.slane %v280_v48, %v3286_v38 }
  0xe6   :  { %2583 = vmatmul.mubr.bf16.gmra.mxu0 %v2760_v51  ;;  %v3306_v58 = vrot.slane %v269_v56, %v3286_v38 }
  0xe8   :  { %1217 = vmatmul.mubr.bf16.gmra.mxu1 %v2760_v51  ;;  %v3309_v51 = vrot.slane %v273_v50, %v3286_v38 }
 0x14e   :  { %v542_v44 = vpop.f32.mrf.mxu0 }
 0x14f   :  { %v543_v47 = vadd.f32 %v542_v44, %v3306_v58 }
 0x150   :  { %v2540_v46 = vpop.f32.mrf.mxu1  ;;  %v544_v52 = vpop.f32.mrf.mxu0 }
 0x151   :  { %v664_v37 = vadd.f32 %v2540_v46, %v3303_v49  ;;  %v545_v45 = vadd.f32 %v544_v52, %v3309_v51 }
 0x152   :  { %v655_v53 = vpop.f32.mrf.mxu1  ;;  %v546_v60 = vpop.f32.mrf.mxu0 }
 0x153   :  { %v2411_v41 = vpack.c.bf16 %v664_v37, %v664_v37  ;;  %v656_v48 = vadd.f32 %v655_v53, %v3303_v49  ;;  %v2406_v62 = vpack.c.bf16 %v545_v45, %v543_v47  ;;  %v547_v46 = vadd.f32 %v546_v60, %v3306_v58 }
 0x154   :  { %v2541_v56 = vpop.f32.mrf.mxu1  ;;  %v548_v57 = vpop.f32.mrf.mxu0 }
 0x155   :  { %883 = vst [vmem:[#allocation2 + $0x20] sm:$0xf] %v2411_v41  ;;  %v2407_v55 = vpack.c.bf16 %v656_v48, %v656_v48  ;;  %v667_v50 = vadd.f32 %v2541_v56, %v3303_v49  ;;  %878 = vst [vmem:[#allocation2] sm:$0xff] %v2406_v62  ;;  %v549_v0 = vadd.f32 %v548_v57, %v3309_v51 }
 0x156   :  { %v658_v44 = vpop.f32.mrf.mxu1  ;;  %v552_v2 = vpop.f32.mrf.mxu0 }
 0x157   :  { %879 = vst [vmem:[#allocation2 + $0x8] sm:$0xf] %v2407_v55  ;;  %v2413_v52 = vpack.c.bf16 %v667_v50, %v667_v50  ;;  %v659_v37 = vadd.f32 %v658_v44, %v3303_v49  ;;  %v2408_v53 = vpack.c.bf16 %v549_v0, %v547_v46  ;;  %v553_v62 = vadd.f32 %v552_v2, %v3306_v58 }
 0x158   :  { %v2544_v59 = vpop.f32.mrf.mxu1  ;;  %v554_v41 = vpop.f32.mrf.mxu0 }
 0x159   :  { %885 = vst [vmem:[#allocation2 + $0x2c] sm:$0xf] %v2413_v52  ;;  %v2409_v47 = vpack.c.bf16 %v659_v37, %v659_v37  ;;  %v680_v45 = vadd.f32 %v2544_v59, %v3303_v49  ;;  %880 = vst [vmem:[#allocation2 + $0xc] sm:$0xff] %v2408_v53  ;;  %v555_v60 = vadd.f32 %v554_v41, %v3309_v51 }
 0x15a   :  { %v671_v48 = vpop.f32.mrf.mxu1  ;;  %v556_v56 = vpop.f32.mrf.mxu0 }
 0x15b   :  { %881 = vst [vmem:[#allocation2 + $0x14] sm:$0xf] %v2409_v47  ;;  %v2419_v57 = vpack.c.bf16 %v680_v45, %v680_v45  ;;  %v672_v55 = vadd.f32 %v671_v48, %v3303_v49  ;;  %v2410_v50 = vpack.c.bf16 %v555_v60, %v553_v62  ;;  %v557_v59 = vadd.f32 %v556_v56, %v3306_v58 }
 0x15c   :  { %v2545_v44 = vpop.f32.mrf.mxu1  ;;  %v558_v52 = vpop.f32.mrf.mxu0 }
 0x15d   :  { %891 = vst [vmem:[#allocation2 + $0x50] sm:$0xf] %v2419_v57  ;;  %v2415_v0 = vpack.c.bf16 %v672_v55, %v672_v55  ;;  %v683_v46 = vadd.f32 %v2545_v44, %v3303_v49  ;;  %882 = vst [vmem:[#allocation2 + $0x18] sm:$0xff] %v2410_v50  ;;  %v559_v2 = vadd.f32 %v558_v52, %v3309_v51 }
 0x15e   :  { %v674_v37 = vpop.f32.mrf.mxu1  ;;  %v562_v45 = vpop.f32.mrf.mxu0 }
 0x15f   :  { %887 = vst [vmem:[#allocation2 + $0x38] sm:$0xf] %v2415_v0  ;;  %v2421_v53 = vpack.c.bf16 %v683_v46, %v683_v46  ;;  %v675_v47 = vadd.f32 %v674_v37, %v3303_v49  ;;  %v2412_v41 = vpack.c.bf16 %v559_v2, %v557_v59  ;;  %v563_v55 = vadd.f32 %v562_v45, %v3306_v58  ;;  %v283_v59 = vld [vmem:[%s3640_s12] sm:$0x7] }
 0x160   :  { %v2548_v48 = vpop.f32.mrf.mxu1  ;;  %v564_v57 = vpop.f32.mrf.mxu0 }
 0x161   :  { %893 = vst [vmem:[#allocation2 + $0x5c] sm:$0xf] %v2421_v53  ;;  %v2417_v62 = vpack.c.bf16 %v675_v47, %v675_v47  ;;  %v696_v60 = vadd.f32 %v2548_v48, %v3303_v49  ;;  %884 = vst [vmem:[#allocation2 + $0x24] sm:$0xff] %v2412_v41  ;;  %v565_v56 = vadd.f32 %v564_v57, %v3309_v51 }
 0x162   :  { %v687_v50 = vpop.f32.mrf.mxu1  ;;  %v566_v46 = vpop.f32.mrf.mxu0 }
 0x163   :  { %889 = vst [vmem:[#allocation2 + $0x44] sm:$0xf] %v2417_v62  ;;  %v2427_v44 = vpack.c.bf16 %v696_v60, %v696_v60  ;;  %v688_v0 = vadd.f32 %v687_v50, %v3303_v49  ;;  %v2414_v52 = vpack.c.bf16 %v565_v56, %v563_v55  ;;  %v567_v45 = vadd.f32 %v566_v46, %v3306_v58 }
 0x164   :  { %v2549_v37 = vpop.f32.mrf.mxu1  ;;  %v568_v47 = vpop.f32.mrf.mxu0  ;;  %v284_v55 = vadd.f32 %v283_v59, %v3284_v43 }
 0x165   :  { %899 = vst [vmem:[#allocation2 + $0x80] sm:$0xf] %v2427_v44  ;;  %v2423_v2 = vpack.c.bf16 %v688_v0, %v688_v0  ;;  %v699_v53 = vadd.f32 %v2549_v37, %v3303_v49  ;;  %886 = vst [vmem:[#allocation2 + $0x30] sm:$0xff] %v2414_v52  ;;  %v569_v41 = vadd.f32 %v568_v47, %v3309_v51 }
 0x166   :  { %v690_v48 = vpop.f32.mrf.mxu1  ;;  %v572_v57 = vpop.f32.mrf.mxu0  ;;  %v289_v43 = vrot.slane %v284_v55, %v3286_v38  ;;  %v293_v59 = vrot.slane %v284_v55, %v3298_v54 }
 0x167   :  { %895 = vst [vmem:[#allocation2 + $0x68] sm:$0xf] %v2423_v2  ;;  %v2429_v62 = vpack.c.bf16 %v699_v53, %v699_v53  ;;  %v691_v60 = vadd.f32 %v690_v48, %v3303_v49  ;;  %v2416_v56 = vpack.c.bf16 %v569_v41, %v567_v45  ;;  %v573_v46 = vadd.f32 %v572_v57, %v3306_v58 }
 0x168   :  { %v2552_v50 = vpop.f32.mrf.mxu1  ;;  %v574_v37 = vpop.f32.mrf.mxu0  ;;  %v3350_v55 = vrot.slane %v289_v43, %v3286_v38 }
 0x169   :  { %901 = vst [vmem:[#allocation2 + $0x8c] sm:$0xf] %v2429_v62  ;;  %v2425_v44 = vpack.c.bf16 %v691_v60, %v691_v60  ;;  %v712_v0 = vadd.f32 %v2552_v50, %v3303_v49  ;;  %888 = vst [vmem:[#allocation2 + $0x3c] sm:$0xff] %v2416_v56  ;;  %v575_v52 = vadd.f32 %v574_v37, %v3309_v51 }
 0x16a   :  { %v703_v47 = vpop.f32.mrf.mxu1  ;;  %v576_v48 = vpop.f32.mrf.mxu0 }
 0x16b   :  { %897 = vst [vmem:[#allocation2 + $0x74] sm:$0xf] %v2425_v44  ;;  %v2435_v2 = vpack.c.bf16 %v712_v0, %v712_v0  ;;  %v704_v53 = vadd.f32 %v703_v47, %v3303_v49  ;;  %v2418_v45 = vpack.c.bf16 %v575_v52, %v573_v46  ;;  %v577_v57 = vadd.f32 %v576_v48, %v3306_v58 }
 0x16c   :  { %v2553_v41 = vpop.f32.mrf.mxu1  ;;  %v578_v56 = vpop.f32.mrf.mxu0  ;;  %v3353_v46 = vrot.slane %v293_v59, %v3286_v38 }
 0x16d   :  { %907 = vst [vmem:[#allocation2 + $0xb0] sm:$0xf] %v2435_v2  ;;  %v2431_v62 = vpack.c.bf16 %v704_v53, %v704_v53  ;;  %v715_v60 = vadd.f32 %v2553_v41, %v3303_v49  ;;  %890 = vst [vmem:[#allocation2 + $0x48] sm:$0xff] %v2418_v45  ;;  %v579_v50 = vadd.f32 %v578_v56, %v3309_v51 }
 0x16e   :  { %v706_v44 = vpop.f32.mrf.mxu1  ;;  %v582_v47 = vpop.f32.mrf.mxu0 }
 0x16f   :  { %903 = vst [vmem:[#allocation2 + $0x98] sm:$0xf] %v2431_v62  ;;  %v2437_v0 = vpack.c.bf16 %v715_v60, %v715_v60  ;;  %v707_v37 = vadd.f32 %v706_v44, %v3303_v49  ;;  %v2420_v52 = vpack.c.bf16 %v579_v50, %v577_v57  ;;  %v583_v48 = vadd.f32 %v582_v47, %v3306_v58 }
 0x170   :  { %v1148_v2 = vpop.f32.mrf.mxu1  ;;  %v584_v45 = vpop.f32.mrf.mxu0 }
 0x171   :  { %909 = vst [vmem:[#allocation2 + $0xbc] sm:$0xf] %v2437_v0  ;;  %v2433_v53 = vpack.c.bf16 %v707_v37, %v707_v37  ;;  %892 = vst [vmem:[#allocation2 + $0x54] sm:$0xff] %v2420_v52  ;;  %v585_v41 = vadd.f32 %v584_v45, %v3309_v51  ;;  %v1149_v49 = vadd.f32 %v1148_v2, %v3350_v55 }
 0x172   :  { %v1150_v62 = vpop.f32.mrf.mxu1  ;;  %v586_v60 = vpop.f32.mrf.mxu0 }
 0x173   :  { %905 = vst [vmem:[#allocation2 + $0xa4] sm:$0xf] %v2433_v53  ;;  %v1151_v43 = vadd.f32 %v1150_v62, %v3353_v46  ;;  %v2422_v56 = vpack.c.bf16 %v585_v41, %v583_v48  ;;  %v587_v50 = vadd.f32 %v586_v60, %v3306_v58 }
 0x174   :  { %v1152_v59 = vpop.f32.mrf.mxu1  ;;  %v588_v57 = vpop.f32.mrf.mxu0 }
 0x175   :  { %v2438_v44 = vpack.c.bf16 %v1151_v43, %v1149_v49  ;;  %894 = vst [vmem:[#allocation2 + $0x60] sm:$0xff] %v2422_v56  ;;  %v589_v0 = vadd.f32 %v588_v57, %v3309_v51  ;;  %v1153_v47 = vadd.f32 %v1152_v59, %v3350_v55 }
 0x176   :  { %v1154_v37 = vpop.f32.mrf.mxu1  ;;  %v592_v53 = vpop.f32.mrf.mxu0 }
 0x177   :  { %1484 = vst [vmem:[#allocation3] sm:$0xff] %v2438_v44  ;;  %v1155_v52 = vadd.f32 %v1154_v37, %v3353_v46  ;;  %v2424_v2 = vpack.c.bf16 %v589_v0, %v587_v50  ;;  %v593_v48 = vadd.f32 %v592_v53, %v3306_v58 }
 0x178   :  { %v1158_v45 = vpop.f32.mrf.mxu1  ;;  %v594_v54 = vpop.f32.mrf.mxu0 }
 0x179   :  { %v2440_v62 = vpack.c.bf16 %v1155_v52, %v1153_v47  ;;  %896 = vst [vmem:[#allocation2 + $0x6c] sm:$0xff] %v2424_v2  ;;  %v595_v41 = vadd.f32 %v594_v54, %v3309_v51  ;;  %v1159_v43 = vadd.f32 %v1158_v45, %v3350_v55 }
 0x17a   :  { %v1160_v49 = vpop.f32.mrf.mxu1  ;;  %v596_v56 = vpop.f32.mrf.mxu0 }
 0x17b   :  { %1486 = vst [vmem:[#allocation3 + $0xc] sm:$0xff] %v2440_v62  ;;  %v1161_v60 = vadd.f32 %v1160_v49, %v3353_v46  ;;  %v2426_v59 = vpack.c.bf16 %v595_v41, %v593_v48  ;;  %v597_v50 = vadd.f32 %v596_v56, %v3306_v58 }
 0x17c   :  { %v1162_v44 = vpop.f32.mrf.mxu1  ;;  %v598_v37 = vpop.f32.mrf.mxu0 }
 0x17d   :  { %v2442_v57 = vpack.c.bf16 %v1161_v60, %v1159_v43  ;;  %898 = vst [vmem:[#allocation2 + $0x78] sm:$0xff] %v2426_v59  ;;  %v599_v0 = vadd.f32 %v598_v37, %v3309_v51  ;;  %v1163_v54 = vadd.f32 %v1162_v44, %v3350_v55 }
 0x17e   :  { %v1164_v47 = vpop.f32.mrf.mxu1  ;;  %v602_v53 = vpop.f32.mrf.mxu0 }
 0x17f   :  { %1488 = vst [vmem:[#allocation3 + $0x18] sm:$0xff] %v2442_v57  ;;  %v1165_v52 = vadd.f32 %v1164_v47, %v3353_v46  ;;  %v2428_v2 = vpack.c.bf16 %v599_v0, %v597_v50  ;;  %v603_v48 = vadd.f32 %v602_v53, %v3306_v58 }
 0x180   :  { %v1168_v45 = vpop.f32.mrf.mxu1  ;;  %v604_v49 = vpop.f32.mrf.mxu0 }
 0x181   :  { %v2444_v62 = vpack.c.bf16 %v1165_v52, %v1163_v54  ;;  %900 = vst [vmem:[#allocation2 + $0x84] sm:$0xff] %v2428_v2  ;;  %v605_v41 = vadd.f32 %v604_v49, %v3309_v51  ;;  %v1169_v60 = vadd.f32 %v1168_v45, %v3350_v55 }
 0x182   :  { %v1170_v43 = vpop.f32.mrf.mxu1  ;;  %v606_v59 = vpop.f32.mrf.mxu0 }
 0x183   :  { %1490 = vst [vmem:[#allocation3 + $0x24] sm:$0xff] %v2444_v62  ;;  %v1171_v56 = vadd.f32 %v1170_v43, %v3353_v46  ;;  %v2430_v44 = vpack.c.bf16 %v605_v41, %v603_v48  ;;  %v607_v50 = vadd.f32 %v606_v59, %v3306_v58 }
 0x184   :  { %v1172_v57 = vpop.f32.mrf.mxu1  ;;  %v608_v47 = vpop.f32.mrf.mxu0 }
 0x185   :  { %v2446_v37 = vpack.c.bf16 %v1171_v56, %v1169_v60  ;;  %902 = vst [vmem:[#allocation2 + $0x90] sm:$0xff] %v2430_v44  ;;  %v609_v0 = vadd.f32 %v608_v47, %v3309_v51  ;;  %v1173_v52 = vadd.f32 %v1172_v57, %v3350_v55 }
 0x186   :  { %v1174_v54 = vpop.f32.mrf.mxu1  ;;  %v612_v2 = vpop.f32.mrf.mxu0 }
 0x187   :  { %1492 = vst [vmem:[#allocation3 + $0x30] sm:$0xff] %v2446_v37  ;;  %v1175_v53 = vadd.f32 %v1174_v54, %v3353_v46  ;;  %v2432_v45 = vpack.c.bf16 %v609_v0, %v607_v50  ;;  %v613_v48 = vadd.f32 %v612_v2, %v3306_v58 }
 0x188   :  { %v1178_v62 = vpop.f32.mrf.mxu1  ;;  %v614_v43 = vpop.f32.mrf.mxu0 }
 0x189   :  { %v2448_v49 = vpack.c.bf16 %v1175_v53, %v1173_v52  ;;  %904 = vst [vmem:[#allocation2 + $0x9c] sm:$0xff] %v2432_v45  ;;  %v615_v41 = vadd.f32 %v614_v43, %v3309_v51  ;;  %v1179_v56 = vadd.f32 %v1178_v62, %v3350_v55 }
 0x18a   :  { %v1180_v60 = vpop.f32.mrf.mxu1  ;;  %v616_v44 = vpop.f32.mrf.mxu0 }
 0x18b   :  { %1494 = vst [vmem:[#allocation3 + $0x3c] sm:$0xff] %v2448_v49  ;;  %v1181_v59 = vadd.f32 %v1180_v60, %v3353_v46  ;;  %v2434_v57 = vpack.c.bf16 %v615_v41, %v613_v48  ;;  %v617_v50 = vadd.f32 %v616_v44, %v3306_v58 }
 0x18c   :  { %v1182_v37 = vpop.f32.mrf.mxu1  ;;  %v618_v54 = vpop.f32.mrf.mxu0 }
 0x18d   :  { %v2450_v47 = vpack.c.bf16 %v1181_v59, %v1179_v56  ;;  %906 = vst [vmem:[#allocation2 + $0xa8] sm:$0xff] %v2434_v57  ;;  %v619_v0 = vadd.f32 %v618_v54, %v3309_v51  ;;  %v1183_v53 = vadd.f32 %v1182_v37, %v3350_v55 }
 0x18e   :  { %v1184_v52 = vpop.f32.mrf.mxu1  ;;  %v2572_v45 = vpop.f32.mrf.mxu0 }
 0x18f   :  { %1496 = vst [vmem:[#allocation3 + $0x48] sm:$0xff] %v2450_v47  ;;  %v1185_v2 = vadd.f32 %v1184_v52, %v3353_v46  ;;  %v2436_v62 = vpack.c.bf16 %v619_v0, %v617_v50  ;;  %v1270_v43 = vadd.f32 %v2572_v45, %v3290_v39 }
 0x190   :  { %v1188_v49 = vpop.f32.mrf.mxu1  ;;  %v1261_v41 = vpop.f32.mrf.mxu0 }
 0x191   :  { %v2452_v48 = vpack.c.bf16 %v1185_v2, %v1183_v53  ;;  %908 = vst [vmem:[#allocation2 + $0xb4] sm:$0xff] %v2436_v62  ;;  %v2443_v60 = vpack.c.bf16 %v1270_v43, %v1270_v43  ;;  %v1262_v58 = vadd.f32 %v1261_v41, %v3290_v39  ;;  %v1189_v51 = vadd.f32 %v1188_v49, %v3350_v55 }
 0x192   :  { %v1190_v56 = vpop.f32.mrf.mxu1  ;;  %v2573_v44 = vpop.f32.mrf.mxu0 }
 0x193   :  { %1498 = vst [vmem:[#allocation3 + $0x54] sm:$0xff] %v2452_v48  ;;  %v1191_v59 = vadd.f32 %v1190_v56, %v3353_v46  ;;  %1489 = vst [vmem:[#allocation3 + $0x20] sm:$0xf] %v2443_v60  ;;  %v2439_v57 = vpack.c.bf16 %v1262_v58, %v1262_v58  ;;  %v1273_v47 = vadd.f32 %v2573_v44, %v3290_v39 }
 0x194   :  { %v1192_v37 = vpop.f32.mrf.mxu1  ;;  %v1264_v50 = vpop.f32.mrf.mxu0 }
 0x195   :  { %v2454_v54 = vpack.c.bf16 %v1191_v59, %v1189_v51  ;;  %1485 = vst [vmem:[#allocation3 + $0x8] sm:$0xf] %v2439_v57  ;;  %v2445_v0 = vpack.c.bf16 %v1273_v47, %v1273_v47  ;;  %v1265_v53 = vadd.f32 %v1264_v50, %v3290_v39  ;;  %v1193_v2 = vadd.f32 %v1192_v37, %v3350_v55 }
 0x196   :  { %v1194_v52 = vpop.f32.mrf.mxu1  ;;  %v2576_v62 = vpop.f32.mrf.mxu0 }
 0x197   :  { %1500 = vst [vmem:[#allocation3 + $0x60] sm:$0xff] %v2454_v54  ;;  %v1195_v45 = vadd.f32 %v1194_v52, %v3353_v46  ;;  %1491 = vst [vmem:[#allocation3 + $0x2c] sm:$0xf] %v2445_v0  ;;  %v2441_v49 = vpack.c.bf16 %v1265_v53, %v1265_v53  ;;  %v1286_v48 = vadd.f32 %v2576_v62, %v3290_v39 }
 0x198   :  { %v1198_v43 = vpop.f32.mrf.mxu1  ;;  %v1277_v60 = vpop.f32.mrf.mxu0 }
 0x199   :  { %v2456_v41 = vpack.c.bf16 %v1195_v45, %v1193_v2  ;;  %1487 = vst [vmem:[#allocation3 + $0x14] sm:$0xf] %v2441_v49  ;;  %v2451_v56 = vpack.c.bf16 %v1286_v48, %v1286_v48  ;;  %v1278_v51 = vadd.f32 %v1277_v60, %v3290_v39  ;;  %v1199_v59 = vadd.f32 %v1198_v43, %v3350_v55 }
 0x19a   :  { %v1200_v58 = vpop.f32.mrf.mxu1  ;;  %v2577_v57 = vpop.f32.mrf.mxu0 }
 0x19b   :  { %1502 = vst [vmem:[#allocation3 + $0x6c] sm:$0xff] %v2456_v41  ;;  %v1201_v44 = vadd.f32 %v1200_v58, %v3353_v46  ;;  %1497 = vst [vmem:[#allocation3 + $0x50] sm:$0xf] %v2451_v56  ;;  %v2447_v37 = vpack.c.bf16 %v1278_v51, %v1278_v51  ;;  %v1289_v54 = vadd.f32 %v2577_v57, %v3290_v39 }
 0x19c   :  { %v1202_v47 = vpop.f32.mrf.mxu1  ;;  %v1280_v0 = vpop.f32.mrf.mxu0 }
 0x19d   :  { %v2458_v50 = vpack.c.bf16 %v1201_v44, %v1199_v59  ;;  %1493 = vst [vmem:[#allocation3 + $0x38] sm:$0xf] %v2447_v37  ;;  %v2453_v52 = vpack.c.bf16 %v1289_v54, %v1289_v54  ;;  %v1281_v2 = vadd.f32 %v1280_v0, %v3290_v39  ;;  %v1203_v45 = vadd.f32 %v1202_v47, %v3350_v55 }
 0x19e   :  { %v1204_v53 = vpop.f32.mrf.mxu1  ;;  %v2580_v49 = vpop.f32.mrf.mxu0 }
 0x19f   :  { %1504 = vst [vmem:[#allocation3 + $0x78] sm:$0xff] %v2458_v50  ;;  %v1205_v62 = vadd.f32 %v1204_v53, %v3353_v46  ;;  %1499 = vst [vmem:[#allocation3 + $0x5c] sm:$0xf] %v2453_v52  ;;  %v2449_v43 = vpack.c.bf16 %v1281_v2, %v1281_v2  ;;  %v1302_v41 = vadd.f32 %v2580_v49, %v3290_v39 }
 0x1a0   :  { %v1208_v48 = vpop.f32.mrf.mxu1  ;;  %v1293_v56 = vpop.f32.mrf.mxu0 }
 0x1a1   :  { %v2460_v60 = vpack.c.bf16 %v1205_v62, %v1203_v45  ;;  %1495 = vst [vmem:[#allocation3 + $0x44] sm:$0xf] %v2449_v43  ;;  %v2459_v58 = vpack.c.bf16 %v1302_v41, %v1302_v41  ;;  %v1294_v59 = vadd.f32 %v1293_v56, %v3290_v39  ;;  %v1209_v44 = vadd.f32 %v1208_v48, %v3350_v55 }
 0x1a2   :  { %v1210_v51 = vpop.f32.mrf.mxu1  ;;  %v2581_v37 = vpop.f32.mrf.mxu0 }
 0x1a3   :  { %1506 = vst [vmem:[#allocation3 + $0x84] sm:$0xff] %v2460_v60  ;;  %v1211_v57 = vadd.f32 %v1210_v51, %v3353_v46  ;;  %1505 = vst [vmem:[#allocation3 + $0x80] sm:$0xf] %v2459_v58  ;;  %v2455_v47 = vpack.c.bf16 %v1294_v59, %v1294_v59  ;;  %v1305_v50 = vadd.f32 %v2581_v37, %v3290_v39 }
 0x1a4   :  { %v1212_v54 = vpop.f32.mrf.mxu1  ;;  %v1296_v52 = vpop.f32.mrf.mxu0 }
 0x1a5   :  { %v2462_v0 = vpack.c.bf16 %v1211_v57, %v1209_v44  ;;  %1501 = vst [vmem:[#allocation3 + $0x68] sm:$0xf] %v2455_v47  ;;  %v2461_v53 = vpack.c.bf16 %v1305_v50, %v1305_v50  ;;  %v1297_v45 = vadd.f32 %v1296_v52, %v3290_v39  ;;  %v1213_v62 = vadd.f32 %v1212_v54, %v3350_v55 }
 0x1a6   :  { %v1214_v2 = vpop.f32.mrf.mxu1  ;;  %v2584_v43 = vpop.f32.mrf.mxu0 }
 0x1a7   :  { %1508 = vst [vmem:[#allocation3 + $0x90] sm:$0xff] %v2462_v0  ;;  %v1215_v49 = vadd.f32 %v1214_v2, %v3353_v46  ;;  %1507 = vst [vmem:[#allocation3 + $0x8c] sm:$0xf] %v2461_v53  ;;  %v2457_v48 = vpack.c.bf16 %v1297_v45, %v1297_v45  ;;  %v1318_v60 = vadd.f32 %v2584_v43, %v3290_v39 }
 0x1a8   :  { %v1218_v41 = vpop.f32.mrf.mxu1  ;;  %v1309_v58 = vpop.f32.mrf.mxu0 }
 0x1a9   :  { %v2464_v56 = vpack.c.bf16 %v1215_v49, %v1213_v62  ;;  %1503 = vst [vmem:[#allocation3 + $0x74] sm:$0xf] %v2457_v48  ;;  %v2467_v51 = vpack.c.bf16 %v1318_v60, %v1318_v60  ;;  %v1310_v44 = vadd.f32 %v1309_v58, %v3290_v39  ;;  %v1219_v57 = vadd.f32 %v1218_v41, %v3350_v55 }
 0x1aa   :  { %v1220_v59 = vpop.f32.mrf.mxu1  ;;  %v2585_v47 = vpop.f32.mrf.mxu0 }
 0x1ab   :  { %1510 = vst [vmem:[#allocation3 + $0x9c] sm:$0xff] %v2464_v56  ;;  %v1221_v37 = vadd.f32 %v1220_v59, %v3353_v46  ;;  %1513 = vst [vmem:[#allocation3 + $0xb0] sm:$0xf] %v2467_v51  ;;  %v2463_v54 = vpack.c.bf16 %v1310_v44, %v1310_v44  ;;  %v1321_v0 = vadd.f32 %v2585_v47, %v3290_v39 }
 0x1ac   :  { %v1222_v50 = vpop.f32.mrf.mxu1  ;;  %v1312_v53 = vpop.f32.mrf.mxu0 }
 0x1ad   :  { %v2466_v52 = vpack.c.bf16 %v1221_v37, %v1219_v57  ;;  %1509 = vst [vmem:[#allocation3 + $0x98] sm:$0xf] %v2463_v54  ;;  %v2469_v2 = vpack.c.bf16 %v1321_v0, %v1321_v0  ;;  %v1313_v62 = vadd.f32 %v1312_v53, %v3290_v39  ;;  %v1223_v49 = vadd.f32 %v1222_v50, %v3350_v55 }
 0x1ae   :  { %v1224_v45 = vpop.f32.mrf.mxu1 }
 0x1af   :  { %1512 = vst [vmem:[#allocation3 + $0xa8] sm:$0xff] %v2466_v52  ;;  %v1225_v43 = vadd.f32 %v1224_v45, %v3353_v46  ;;  %1515 = vst [vmem:[#allocation3 + $0xbc] sm:$0xf] %v2469_v2  ;;  %v2465_v48 = vpack.c.bf16 %v1313_v62, %v1313_v62  ;;  %2203 = sbr.rel (%p2342_p2) target bundleno = 758 (0x2f6), region = 103 }
 0x1b1   :  { %v2468_v41 = vpack.c.bf16 %v1225_v43, %v1223_v49  ;;  %1511 = vst [vmem:[#allocation3 + $0xa4] sm:$0xf] %v2465_v48 }
 0x1b3   :  { %1514 = vst [vmem:[#allocation3 + $0xb4] sm:$0xff] %v2468_v41 }
 0x1b4   :  { %v3422_v60 = vmov 0.0   ;;  %v3424_v56 = vmov 0.0   ;;  %v3426_v39 = vmov 0.0   ;;  %v3428_v58 = vmov 0.0  }
 0x1b5 LB: > { %v3728_v21 = vld [vmem:[#allocation41_spill] sm:$0xff]  ;;  %v3729_v19 = vld [vmem:[#allocation39_spill] sm:$0xff]  ;;  %v2366_v55 = vcombine.high %v3164_v31, %v3168_v33  ;;  %v2365_v46 = vcombine.low %v3164_v31, %v3168_v33  ;;  %v2363_v51 = vcombine.high %v3156_v27, %v3160_v29  ;;  %v2362_v59 = vcombine.low %v3156_v27, %v3160_v29  ;;  %v3739_v22 = vld [vmem:[#allocation42_spill] sm:$0xff]  ;;  %s2470_s29 = smul.u32 24, %s2977_s24  ;;  %v2961_v60 = vphi %v3422_v60, %v2097_v60   ;;  %s2977_s24 = sphi %s3430_s24, %s1528_s24   ;;  %v2973_v58 = vphi %v3428_v58, %v1815_v58   ;;  %v2969_v39 = vphi %v3426_v39, %v1816_v39   ;;  %v2965_v56 = vphi %v3424_v56, %v2096_v56  }
 0x1b6   : > { %v3730_v17 = vld [vmem:[#allocation37_spill] sm:$0xff]  ;;  %v3731_v15 = vld [vmem:[#allocation35_spill] sm:$0xff]  ;;  %v2367_v44 = vcombine.low %v3166_v32, %v3170_v34  ;;  %v2360_v57 = vcombine.high %v3148_v23, %v3152_v25  ;;  %v2991_v37 = vmov 0.0   ;;  %v2992_v47 = vmov 0   ;;  %v3740_v20 = vld [vmem:[#allocation40_spill] sm:$0xff] }
 0x1b7   : > { %v3732_v13 = vld [vmem:[#allocation33_spill] sm:$0xff]  ;;  %v3733_v11 = vld [vmem:[#allocation31_spill] sm:$0xff]  ;;  %1671 = vmatprep.subr.bf16.mxu0 %v2366_v55  ;;  %2586 = vmatprep.subr.bf16.mxu1 %v2991_v37  ;;  %v2364_v54 = vcombine.low %v3158_v28, %v3162_v30  ;;  %v2359_v50 = vcombine.low %v3148_v23, %v3152_v25  ;;  %v2357_v0 = vcombine.high %v3729_v19, %v3728_v21  ;;  %vm2993_vm0 = vmmov 0   ;;  %v3741_v18 = vld [vmem:[#allocation38_spill] sm:$0xff]  ;;  %s3583_s30 = scalar_lea.vmem [#allocation2], %s2470_s29  ;;  %s3589_s18 = scalar_lea.vmem [#allocation3], %s2470_s29 }
 0x1b8   : > { %v3734_v9 = vld [vmem:[#allocation29_spill] sm:$0xff]  ;;  %v3735_v7 = vld [vmem:[#allocation27_spill] sm:$0xff]  ;;  %1672 = vmatpush1.bf16.msra.mxu0 %v2365_v46  ;;  %2587 = vmatpush3.bf16.msra.mxu1 %v2367_v44  ;;  %v2361_v52 = vcombine.low %v3150_v24, %v3154_v26  ;;  %v2356_v53 = vcombine.low %v3729_v19, %v3728_v21  ;;  %v2354_v2 = vcombine.high %v3731_v15, %v3730_v17  ;;  %v2098_v49 = vstv %s2977_s24  ;;  %v3742_v16 = vld [vmem:[#allocation36_spill] sm:$0xff]  ;;  %s1528_s24 = sadd.s32 1, %s2977_s24  }
 0x1b9   : > { %v3736_v5 = vld [vmem:[#allocation25_spill] sm:$0xff]  ;;  %v3737_v3 = vld [vmem:[#allocation23_spill] sm:$0xff]  ;;  %1673 = vmatprep.subr.bf16.mxu0 %v2363_v51  ;;  %1703 = vmatprep.mubr.bf16.mxu0 %v2992_v47  ;;  %v2358_v45 = vcombine.low %v3740_v20, %v3739_v22  ;;  %v2353_v62 = vcombine.low %v3731_v15, %v3730_v17  ;;  %v2351_v43 = vcombine.high %v3733_v11, %v3732_v13  ;;  %v3743_v14 = vld [vmem:[#allocation34_spill] sm:$0xff]  ;;  %p1527_p3 = scmp.ge.s32.totalorder %s1528_s24, %s3628_s0 }
 0x1ba   : > { %v3738_v1 = vld [vmem:[#allocation71_spill] sm:$0xff]  ;;  %2588 = vmatprep.subr.bf16.mxu1 %v2991_v37  ;;  %2761 = vset.pattern.permute.xlu0 %v2992_v47  ;;  %vm2099_vm1 = vcmp.eq.s32.totalorder %v3249_v40, %v2098_v49  ;;  %vm2100_vm2 = vcmp.eq.s32.totalorder %v3254_v42, %v2098_v49  ;;  %vm2117_vm3 = vcmp.eq.s32.totalorder %v3259_v35, %v2098_v49  ;;  %v3744_v12 = vld [vmem:[#allocation32_spill] sm:$0xff]  ;;  %v3745_v10 = vld [vmem:[#allocation30_spill] sm:$0xff] }
 0x1bb   : > { %2762 = vset.pattern.permute.xlu1 %v2992_v47  ;;  %2602 = vmatprep.mubr.msk.bf16.mxu1 %vm2993_vm0, %v2991_v37  ;;  %v2355_v48 = vcombine.low %v3742_v16, %v3741_v18  ;;  %v2103_v41 = vsel %vm2099_vm1, 1, %v2992_v47  ;;  %v2121_v55 = vsel %vm2117_vm3, 1, %v2992_v47  ;;  %vm2118_vm4 = vcmp.eq.s32.totalorder %v3264_v36, %v2098_v49  ;;  %v3746_v8 = vld [vmem:[#allocation28_spill] sm:$0xff]  ;;  %v3747_v6 = vld [vmem:[#allocation26_spill] sm:$0xff]  ;;  %v3749_v49 = vld [vmem:[#allocation67_spill] sm:$0xff] }
 0x1bc   : > { %1674 = vmatpush1.bf16.msra.mxu0 %v2362_v59  ;;  %2589 = vmatpush3.bf16.msra.mxu1 %v2364_v54  ;;  %v2350_v46 = vcombine.low %v3733_v11, %v3732_v13  ;;  %v2104_v51 = vsel %vm2100_vm2, 1, %v2992_v47  ;;  %v2348_v59 = vcombine.high %v3735_v7, %v3734_v9  ;;  %v2122_v44 = vsel %vm2118_vm4, 1, %v2992_v47  ;;  %v3748_v4 = vld [vmem:[#allocation24_spill] sm:$0xff] }
 0x1bd   : > { %1675 = vmatprep.subr.bf16.mxu0 %v2360_v57  ;;  %2590 = vmatprep.subr.bf16.mxu1 %v2991_v37  ;;  %v2352_v57 = vcombine.low %v3744_v12, %v3743_v14  ;;  %v2347_v54 = vcombine.low %v3735_v7, %v3734_v9 }
 0x1be   : > { %2106 = vperm.xlu0 %2761, %v2103_v41   ;;  %2124 = vperm.xlu1 %2762, %v2121_v55   ;;  %v3751_v41 = vld [vmem:[#allocation70_spill] sm:$0xff] }
 0x1c0   : > { %1676 = vmatpush1.bf16.msra.mxu0 %v2359_v50  ;;  %2591 = vmatpush3.bf16.msra.mxu1 %v2361_v52  ;;  %v2345_v50 = vcombine.high %v3737_v3, %v3736_v5  ;;  %v2344_v52 = vcombine.low %v3737_v3, %v3736_v5  ;;  %v3770_v3 = vld [vmem:[#allocation54_spill] sm:$0xff] }
 0x1c1   : > { %1677 = vmatprep.subr.bf16.mxu0 %v2357_v0  ;;  %2592 = vmatprep.subr.bf16.mxu1 %v2991_v37  ;;  %v2349_v0 = vcombine.low %v3746_v8, %v3745_v10 }
 0x1c2   : > { %2109 = vperm.xlu0 %2761, %v2104_v51   ;;  %2127 = vperm.xlu1 %2762, %v2122_v44   ;;  %v3752_v51 = vld [vmem:[#allocation65_spill] sm:$0xff] }
 0x1c4   : > { %1678 = vmatpush1.bf16.msra.mxu0 %v2356_v53  ;;  %2593 = vmatpush3.bf16.msra.mxu1 %v2358_v45  ;;  %v2396_v53 = vcombine.high %v3228_v63, %v3738_v1  ;;  %v1542_v45 = vpack.c.bf16 %v2969_v39, %v2973_v58 }
 0x1c5   : > { %1679 = vmatprep.subr.bf16.mxu0 %v2354_v2  ;;  %2594 = vmatprep.subr.bf16.mxu1 %v2991_v37  ;;  %v2346_v2 = vcombine.low %v3748_v4, %v3747_v6 }
 0x1c8   : > { %1680 = vmatpush1.bf16.msra.mxu0 %v2353_v62  ;;  %2595 = vmatpush3.bf16.msra.mxu1 %v2355_v48  ;;  %v2395_v62 = vcombine.low %v3228_v63, %v3738_v1  ;;  %v3750_v48 = vld [vmem:[#allocation72_spill] sm:$0xff] }
 0x1c9   : > { %1681 = vmatprep.subr.bf16.mxu0 %v2351_v43  ;;  %2596 = vmatprep.subr.bf16.mxu1 %v2991_v37  ;;  %v2393_v43 = vcombine.high %v3749_v49, %v3224_v61  ;;  %v2397_v55 = vcombine.low %v3751_v41, %v3750_v48  ;;  %v3760_v48 = vld [vmem:[#allocation57_spill] sm:$0xff]  ;;  %v3761_v41 = vld [vmem:[#allocation55_spill] sm:$0xff] }
 0x1cc   : > { %1682 = vmatpush1.bf16.msra.mxu0 %v2350_v46  ;;  %2597 = vmatpush3.bf16.msra.mxu1 %v2352_v57  ;;  %v2392_v46 = vcombine.low %v3749_v49, %v3224_v61  ;;  %v3754_v57 = vld [vmem:[#allocation69_spill] sm:$0xff] }
 0x1cd   : > { %1683 = vmatprep.subr.bf16.mxu0 %v2348_v59  ;;  %2598 = vmatprep.subr.bf16.mxu1 %v2991_v37  ;;  %v3753_v59 = vld [vmem:[#allocation63_spill] sm:$0xff] }
 0x1ce   : > { %v2390_v44 = vcombine.high %v3753_v59, %v3752_v51 }
 0x1d0   : > { %1684 = vmatpush1.bf16.msra.mxu0 %v2347_v54  ;;  %2599 = vmatpush3.bf16.msra.mxu1 %v2349_v0  ;;  %v3755_v54 = vld [vmem:[#allocation68_spill] sm:$0xff]  ;;  %v2389_v0 = vcombine.low %v3753_v59, %v3752_v51 }
 0x1d1   : > { %1685 = vmatprep.subr.bf16.mxu0 %v2345_v50  ;;  %2600 = vmatprep.subr.bf16.mxu1 %v2991_v37  ;;  %v2394_v50 = vcombine.low %v3755_v54, %v3754_v57  ;;  %v2383_v54 = vcombine.low %v3761_v41, %v3760_v48 }
 0x1d4   : > { %1686 = vmatpush1.bf16.msra.mxu0 %v2344_v52  ;;  %2601 = vmatpush3.bf16.msra.mxu1 %v2346_v2  ;;  %v3757_v52 = vld [vmem:[#allocation59_spill] sm:$0xff]  ;;  %v3758_v2 = vld [vmem:[#allocation66_spill] sm:$0xff] }
 0x1d5   : > { %1952 = vmatprep.subr.bf16.mxu0 %v2396_v53  ;;  %2606 = vmatprep.subr.bf16.mxu1 %v2991_v37 }
 0x1d7   : > { %1704 = vmatmul.mubr.bf16.vlgmr.msra.gmra.mxu0 %v1542_v45  ;;  %2603 = vmatmul.mubr.bf16.vlgmr.msra.gmra.mxu1 %v1542_v45  ;;  %v3759_v45 = vld [vmem:[#allocation64_spill] sm:$0xff] }
 0x1d8   : > { %1953 = vmatpush1.bf16.msra.mxu0 %v2395_v62  ;;  %1984 = vmatprep.mubr.bf16.mxu0 %v2992_v47  ;;  %v3756_v47 = vld [vmem:[#allocation61_spill] sm:$0xff]  ;;  %v2391_v62 = vcombine.low %v3759_v45, %v3758_v2  ;;  %v3766_v45 = vld [vmem:[#allocation58_spill] sm:$0xff] }
 0x1d9   : > { %1954 = vmatprep.subr.bf16.mxu0 %v2393_v43  ;;  %2607 = vmatpush3.bf16.msra.mxu1 %v2397_v55  ;;  %v2387_v53 = vcombine.high %v3757_v52, %v3756_v47  ;;  %v2386_v43 = vcombine.low %v3757_v52, %v3756_v47  ;;  %v2384_v55 = vcombine.high %v3761_v41, %v3760_v48 }
 0x1da   : > { %2622 = vmatprep.mubr.msk.bf16.mxu1 %vm2993_vm0, %v2991_v37  ;;  %2608 = vmatprep.subr.bf16.mxu1 %v2991_v37 }
 0x1dc   : > { %1955 = vmatpush1.bf16.msra.mxu0 %v2392_v46  ;;  %v3762_v46 = vld [vmem:[#allocation62_spill] sm:$0xff] }
 0x1dd   : > { %1956 = vmatprep.subr.bf16.mxu0 %v2390_v44  ;;  %2609 = vmatpush3.bf16.msra.mxu1 %v2394_v50  ;;  %v3763_v44 = vld [vmem:[#allocation60_spill] sm:$0xff]  ;;  %v3764_v50 = vld [vmem:[#allocation53_spill] sm:$0xff] }
 0x1de   : > { %2610 = vmatprep.subr.bf16.mxu1 %v2991_v37  ;;  %v2388_v57 = vcombine.low %v3763_v44, %v3762_v46  ;;  %v3768_v46 = vld [vmem:[#allocation49_spill] sm:$0xff] }
 0x1e0   : > { %1957 = vmatpush1.bf16.msra.mxu0 %v2389_v0  ;;  %v3765_v0 = vld [vmem:[#allocation51_spill] sm:$0xff] }
 0x1e1   : > { %1958 = vmatprep.subr.bf16.mxu0 %v2387_v53  ;;  %2611 = vmatpush3.bf16.msra.mxu1 %v2391_v62  ;;  %v2381_v2 = vcombine.high %v3765_v0, %v3764_v50  ;;  %v3767_v53 = vld [vmem:[#allocation56_spill] sm:$0xff]  ;;  %v2380_v62 = vcombine.low %v3765_v0, %v3764_v50 }
 0x1e2   : > { %2612 = vmatprep.subr.bf16.mxu1 %v2991_v37  ;;  %v2385_v1 = vcombine.low %v3767_v53, %v3766_v45  ;;  %v3772_v45 = vld [vmem:[#allocation45_spill] sm:$0xff]  ;;  %v3775_v0 = vld [vmem:[#allocation48_spill] sm:$0xff] }
 0x1e4   : > { %1959 = vmatpush1.bf16.msra.mxu0 %v2386_v43  ;;  %v3769_v43 = vld [vmem:[#allocation47_spill] sm:$0xff] }
 0x1e5   : > { %1960 = vmatprep.subr.bf16.mxu0 %v2384_v55  ;;  %2613 = vmatpush3.bf16.msra.mxu1 %v2388_v57  ;;  %v2378_v44 = vcombine.high %v3769_v43, %v3768_v46  ;;  %v3771_v55 = vld [vmem:[#allocation52_spill] sm:$0xff]  ;;  %v2377_v57 = vcombine.low %v3769_v43, %v3768_v46 }
 0x1e6   : > { %2614 = vmatprep.subr.bf16.mxu1 %v2991_v37  ;;  %v2382_v4 = vcombine.low %v3771_v55, %v3770_v3  ;;  %v1823_v55 = vpack.c.bf16 %v2961_v60, %v2965_v56 }
 0x1e8   : > { %1961 = vmatpush1.bf16.msra.mxu0 %v2383_v54  ;;  %v3773_v54 = vld [vmem:[#allocation43_spill] sm:$0xff] }
 0x1e9   : > { %1962 = vmatprep.subr.bf16.mxu0 %v2381_v2  ;;  %2615 = vmatpush3.bf16.msra.mxu1 %v2385_v1  ;;  %v2375_v53 = vcombine.high %v3773_v54, %v3772_v45  ;;  %v3774_v2 = vld [vmem:[#allocation50_spill] sm:$0xff]  ;;  %v2374_v3 = vcombine.low %v3773_v54, %v3772_v45 }
 0x1ea   : > { %2616 = vmatprep.subr.bf16.mxu1 %v2991_v37  ;;  %v2379_v5 = vcombine.low %v3775_v0, %v3774_v2  ;;  %v3776_v1 = vld [vmem:[#allocation46_spill] sm:$0xff]  ;;  %v1540_v0 = vld [vmem:[%s3583_s30 + $0xc] sm:$0xff] }
 0x1eb   : > { %v1774_v6 = vrot.slane %v1540_v0, 4 }
 0x1ec   : > { %1963 = vmatpush1.bf16.msra.mxu0 %v2380_v62  ;;  %v3777_v62 = vld [vmem:[#allocation44_spill] sm:$0xff] }
 0x1ed   : > { %1964 = vmatprep.subr.bf16.mxu0 %v2378_v44  ;;  %2617 = vmatpush3.bf16.msra.mxu1 %v2382_v4  ;;  %v2376_v44 = vcombine.low %v3777_v62, %v3776_v1  ;;  %v1538_v4 = vld [vmem:[%s3583_s30] sm:$0xff]  ;;  %v1756_v1 = vunpack.c.l.bf16 %v1540_v0  ;;  %v1778_v9 = vunpack.c.l.bf16 %v1774_v6 }
 0x1ee   : > { %2618 = vmatprep.subr.bf16.mxu1 %v2991_v37  ;;  %v1819_v6 = vld [vmem:[%s3589_s18] sm:$0xff] }
 0x1f0   : > { %1965 = vmatpush1.bf16.msra.mxu0 %v2377_v57  ;;  %v1773_v57 = vrot.slane %v1538_v4, 4 }
 0x1f1   : > { %1966 = vmatprep.subr.bf16.mxu0 %v2375_v53  ;;  %2619 = vmatpush3.bf16.msra.mxu1 %v2379_v5  ;;  %v1755_v5 = vunpack.c.l.bf16 %v1538_v4 }
 0x1f2   : > { %2620 = vmatprep.subr.bf16.mxu1 %v2991_v37 }
 0x1f4   : > { %1967 = vmatpush1.bf16.msra.mxu0 %v2374_v3 }
 0x1f5   : > { %2621 = vmatpush3.bf16.msra.mxu1 %v2376_v44  ;;  %v1777_v44 = vunpack.c.l.bf16 %v1773_v57 }
 0x1f7   : > { %1985 = vmatmul.mubr.bf16.vlgmr.msra.gmra.mxu0 %v1823_v55 }
 0x1f8   : > { %2623 = vmatmul.mubr.bf16.vlgmr.msra.gmra.mxu1 %v1823_v55 }
 0x297   : > { %v1705_v53 = vpop.f32.mrf.mxu0  ;;  %v1748_v37 = vpop.f32.mrf.mxu1 }
 0x298   : > { %v1757_v2 = vadd.f32 %v1755_v5, %v1705_v53 }
 0x299   : > { %v1707_v62 = vpop.f32.mrf.mxu0  ;;  %v2604_v55 = vpop.f32.mrf.mxu1 }
 0x29a   : > { %v2368_v3 = vmul.f32 -1.442695, %v1757_v2  ;;  %v1779_v11 = vadd.f32 %v1777_v44, %v1707_v62  ;;  %v2054_v62 = vrot.slane %v1819_v6, 4 }
 0x29b   : > { %v1709_v7 = vpop.f32.mrf.mxu0  ;;  %v1751_v10 = vpop.f32.mrf.mxu1 }
 0x29c   : > { %2763 = vpow2.f32 %v2368_v3  ;;  %v1758_v8 = vadd.f32 %v1756_v1, %v1709_v7  ;;  %v2370_v5 = vmul.f32 -1.442695, %v1779_v11  ;;  %v2058_v17 = vunpack.c.l.bf16 %v2054_v62 }
 0x29d   : > { %v1711_v13 = vpop.f32.mrf.mxu0  ;;  %v2605_v14 = vpop.f32.mrf.mxu1 }
 0x29e   : > { %v2369_v12 = vmul.f32 -1.442695, %v1758_v8  ;;  %v1780_v4 = vadd.f32 %v1778_v9, %v1711_v13  ;;  %v2036_v8 = vunpack.c.l.bf16 %v1819_v6  ;;  %v1821_v9 = vld [vmem:[%s3589_s18 + $0xc] sm:$0xff] }
 0x29f   : > { %v3778_v14 = vld [vmem:[#allocation73_spill] sm:$0xff] }
 0x2a0   : > { %2765 = vpow2.f32 %v2369_v12  ;;  %v2371_v53 = vmul.f32 -1.442695, %v1780_v4  ;;  %v1539_v12 = vld [vmem:[%s3583_s30 + $0x8] ss:$12 sps:$4 sm:$0xff]   ;;  %v1799_v1 = vadd.f32 %v3778_v14, %v1748_v37  ;;  %v1800_v37 = vadd.f32 %v3778_v14, %v1751_v10 }
 0x2a1   : > { %2767 = vpow2.f32 %v2370_v5  ;;  %v1803_v55 = vunpack.c.l.bf16 %v1539_v12  ;;  %v2037_v5 = vunpack.c.l.bf16 %v1821_v9  ;;  %v1804_v18 = vunpack.c.h.bf16 %v1539_v12 }
 0x2a2   : > { %2769 = vpow2.f32 %v2371_v53 }
 0x2a9   : > { %v2764_v0 = vpop.eup %2763 }
 0x2aa   : > { %v1765_v57 = vadd.f32 1.0, %v2764_v0 }
 0x2ac   : > { %2771 = vrcp.f32 %v1765_v57 }
 0x2ad   : > { %v2766_v2 = vpop.eup %2765 }
 0x2ae   : > { %v1766_v3 = vadd.f32 1.0, %v2766_v2  ;;  %v2768_v7 = vpop.eup %2767  ;;  %v2055_v2 = vrot.slane %v1821_v9, 4 }
 0x2af   : > { %v2770_v11 = vpop.eup %2769  ;;  %v1787_v13 = vadd.f32 1.0, %v2768_v7 }
 0x2b0   : > { %2773 = vrcp.f32 %v1766_v3  ;;  %v1788_v0 = vadd.f32 1.0, %v2770_v11 }
 0x2b1   : > { %2775 = vrcp.f32 %v1787_v13 }
 0x2b7   : > { %v1986_v44 = vpop.f32.mrf.mxu0 }
 0x2b8   : > { %v2038_v4 = vadd.f32 %v2036_v8, %v1986_v44  ;;  %v2029_v3 = vpop.f32.mrf.mxu1  ;;  %v2059_v8 = vunpack.c.l.bf16 %v2055_v2 }
 0x2b9   : > { %v2772_v53 = vpop.eup %2771  ;;  %v1988_v57 = vpop.f32.mrf.mxu0 }
 0x2ba   : > { %v1801_v15 = vmul.f32 %v2772_v53, %v1799_v1  ;;  %v2398_v16 = vmul.f32 -1.442695, %v2038_v4  ;;  %v2624_v20 = vpop.f32.mrf.mxu1  ;;  %v2060_v9 = vadd.f32 %v2058_v17, %v1988_v57 }
 0x2bb   : > { %v1990_v19 = vpop.f32.mrf.mxu0 }
 0x2bc   : > { %v1805_v7 = vadd.f32 %v1803_v55, %v1801_v15  ;;  %2777 = vpow2.f32 %v2398_v16  ;;  %v2039_v6 = vadd.f32 %v2037_v5, %v1990_v19  ;;  %v2032_v44 = vpop.f32.mrf.mxu1  ;;  %v2400_v20 = vmul.f32 -1.442695, %v2060_v9  ;;  %v2107_v16 = vpop.permute.xlu0 %2106 }
 0x2bd   : > { %v2774_v21 = vpop.eup %2773  ;;  %2779 = vrcp.f32 %v1788_v0  ;;  %v1992_v13 = vpop.f32.mrf.mxu0  ;;  %vm2111_vm5 = vcmp.eq.s32.totalorder %v2107_v16, 1 }
 0x2be   : > { %2781 = vtanh.f32 %v1805_v7  ;;  %v1802_v11 = vmul.f32 %v2774_v21, %v1800_v37  ;;  %v2399_v22 = vmul.f32 -1.442695, %v2039_v6  ;;  %v2625_v1 = vpop.f32.mrf.mxu1  ;;  %v2061_v12 = vadd.f32 %v2059_v8, %v1992_v13  ;;  %v2776_v10 = vpop.eup %2775 }
 0x2bf   : > { %v1809_v5 = vsub.f32 1.0, %v2776_v10  ;;  %v1813_v21 = vmul.f32 %v2973_v58, %v2776_v10  ;;  %v1820_v1 = vld [vmem:[%s3589_s18 + $0x8] ss:$12 sps:$4 sm:$0xff]  }
 0x2c0   : > { %v1806_v4 = vadd.f32 %v1804_v18, %v1802_v11  ;;  %2783 = vpow2.f32 %v2399_v22  ;;  %v2401_v15 = vmul.f32 -1.442695, %v2061_v12  ;;  %v2101_v18 = vld [vmem:[#allocation4] sm:$0xff]  ;;  %v2110_v57 = vpop.permute.xlu0 %2109  ;;  %v2102_v11 = vld [vmem:[#allocation4 + $0x8] sm:$0xff]  ;;  %v2084_v10 = vunpack.c.l.bf16 %v1820_v1 }
 0x2c1   : > { %vm2112_vm6 = vcmp.eq.s32.totalorder %v2110_v57, 1  ;;  %v2125_v57 = vpop.permute.xlu1 %2124 }
 0x2c2   : > { %2785 = vtanh.f32 %v1806_v4  ;;  %vm2129_vm7 = vcmp.eq.s32.totalorder %v2125_v57, 1 }
 0x2c3   : > { %2787 = vpow2.f32 %v2400_v20  ;;  %v3779_v20 = vld [vmem:[#allocation74_spill] sm:$0xff] }
 0x2c4   : > { %2789 = vpow2.f32 %v2401_v15  ;;  %v2080_v15 = vadd.f32 %v3779_v20, %v2029_v3 }
 0x2c9   : > { %v2778_v19 = vpop.eup %2777 }
 0x2ca   : > { %v2780_v62 = vpop.eup %2779  ;;  %v2046_v55 = vadd.f32 1.0, %v2778_v19 }
 0x2cb   : > { %v2782_v53 = vpop.eup %2781  ;;  %v1810_v2 = vsub.f32 1.0, %v2780_v62  ;;  %v1814_v8 = vmul.f32 %v2969_v39, %v2780_v62  ;;  %v2081_v62 = vadd.f32 %v3779_v20, %v2032_v44 }
 0x2cc   : > { %2791 = vrcp.f32 %v2046_v55  ;;  %v1811_v17 = vmul.f32 %v2782_v53, %v1809_v5  ;;  %v2085_v53 = vunpack.c.h.bf16 %v1820_v1 }
 0x2cd   : > { %v2784_v0 = vpop.eup %2783 }
 0x2ce   : > { %v2047_v22 = vadd.f32 1.0, %v2784_v0  ;;  %v1815_v58 = vadd.f32 %v1813_v21, %v1811_v17  }
 0x2cf   : > { %v2786_v7 = vpop.eup %2785 }
 0x2d0   : > { %2793 = vrcp.f32 %v2047_v22  ;;  %v2113_v37 = vsel %vm2111_vm5, %v1815_v58, %v2101_v18  ;;  %v1812_v6 = vmul.f32 %v2786_v7, %v1810_v2  ;;  %v2788_v9 = vpop.eup %2787 }
 0x2d1   : > { %2115 = vst [vmem:[#allocation4] sm:$0xff] %v2113_v37  ;;  %v2790_v4 = vpop.eup %2789  ;;  %v2068_v12 = vadd.f32 1.0, %v2788_v9  ;;  %v2128_v9 = vpop.permute.xlu1 %2127 }
 0x2d2   : > { %v1816_v39 = vadd.f32 %v1814_v8, %v1812_v6   ;;  %v2069_v19 = vadd.f32 1.0, %v2790_v4  ;;  %v2119_v6 = vld [vmem:[#allocation5 + $0x8] sm:$0xff]  ;;  %v2120_v4 = vld [vmem:[#allocation5] sm:$0xff]  ;;  %vm2130_vm8 = vcmp.eq.s32.totalorder %v2128_v9, 1 }
 0x2d3   : > { %2795 = vrcp.f32 %v2068_v12 }
 0x2d4   : > { %v2114_v13 = vsel %vm2112_vm6, %v1816_v39, %v2102_v11  ;;  %2797 = vrcp.f32 %v2069_v19 }
 0x2d5   : > { %2116 = vst [vmem:[#allocation4 + $0x8] sm:$0xff] %v2114_v13 }
 0x2d9   : > { %v2792_v16 = vpop.eup %2791 }
 0x2da   : > { %v2082_v55 = vmul.f32 %v2792_v16, %v2080_v15 }
 0x2dc   : > { %v2086_v5 = vadd.f32 %v2084_v10, %v2082_v55 }
 0x2dd   : > { %v2794_v17 = vpop.eup %2793 }
 0x2de   : > { %2799 = vtanh.f32 %v2086_v5  ;;  %v2083_v21 = vmul.f32 %v2794_v17, %v2081_v62 }
 0x2e0   : > { %v2087_v0 = vadd.f32 %v2085_v53, %v2083_v21  ;;  %v2796_v18 = vpop.eup %2795 }
 0x2e1   : > { %v2798_v22 = vpop.eup %2797  ;;  %v2090_v2 = vsub.f32 1.0, %v2796_v18  ;;  %v2094_v37 = vmul.f32 %v2965_v56, %v2796_v18 }
 0x2e2   : > { %2801 = vtanh.f32 %v2087_v0  ;;  %v2091_v8 = vsub.f32 1.0, %v2798_v22  ;;  %v2095_v1 = vmul.f32 %v2961_v60, %v2798_v22 }
 0x2eb   : > { %v2800_v3 = vpop.eup %2799 }
 0x2ec   : > { %v2092_v7 = vmul.f32 %v2800_v3, %v2090_v2 }
 0x2ee   : > { %v2096_v56 = vadd.f32 %v2094_v37, %v2092_v7  }
 0x2ef   : > { %v2802_v44 = vpop.eup %2801 }
 0x2f0   : > { %v2131_v11 = vsel %vm2129_vm7, %v2096_v56, %v2119_v6  ;;  %v2093_v13 = vmul.f32 %v2802_v44, %v2091_v8 }
 0x2f1   : > { %2133 = vst [vmem:[#allocation5 + $0x8] sm:$0xff] %v2131_v11  ;;  %1530 = sbr.rel (!%p1527_p3) target bundleno = 437 (0x1b5), region = 109 }
 0x2f2   : > { %v2097_v60 = vadd.f32 %v2095_v1, %v2093_v13  }
 0x2f4   : > { %v2132_v12 = vsel %vm2130_vm8, %v2097_v60, %v2120_v4 }
 0x2f5   : > { %2134 = vst [vmem:[#allocation5] sm:$0xff] %v2132_v12 }
 0x2f6 PF:  { %v2135_v15 = vld [vmem:[#allocation4] sm:$0xff]  ;;  %v2136_v62 = vld [vmem:[#allocation4 + $0x8] sm:$0xff]  ;;  %vm2182_vm9 = vcmask 7168  }
 0x2f7   :  { %v2139_v16 = vld [vmem:[%s3641_s13] sm:$0x3] }
 0x2f8   :  { %v2137_v10 = vld [vmem:[#allocation5 + $0x8] sm:$0xff]  ;;  %v2144_v19 = vrot.slane %v2139_v16, %v3286_v38  ;;  %v3780_v55 = vld [vmem:[#allocation75_spill] sm:$0xff]  ;;  %v2403_v23 = vld [vmem:[#allocation8] ss:$0 sm:$0xff] }
 0x2f9   :  { %v2148_v5 = vrot.slane %v2139_v16, %v3780_v55 }
 0x2fa   :  { %v2151_v17 = vmul.f32 %v2144_v19, %v2135_v15  ;;  %v2153_v0 = vmul.f32 %v2144_v19, %v2136_v62 }
 0x2fb   :  { %v2152_v21 = vmul.f32 %v2148_v5, %v2137_v10 }
 0x2fc   :  { %v2138_v53 = vld [vmem:[#allocation5] sm:$0xff] }
 0x2fd   :  { %v2154_v58 = vmul.f32 %v2148_v5, %v2138_v53  ;;  %v2155_v18 = vadd.f32 %v2152_v21, %v2151_v17 }
 0x2ff   :  { %2156 = vadd.xlane.f32.xlu0 %v2155_v18  ;;  %v2158_v22 = vadd.f32 %v2154_v58, %v2153_v0 }
 0x303   :  { %2159 = vadd.xlane.f32.xlu0 %v2158_v22 }
 0x388   :  { %v2157_v24 = vpop.xlane.xlu0 %2156 }
 0x389   :  { %v2168_v25 = vadd.f32 %v2403_v23, %v2157_v24 }
 0x38b   :  { %v2404_v26 = vmul.f32 -1.442695, %v2168_v25 }
 0x38c   :  { %v2160_v27 = vpop.xlane.xlu0 %2159 }
 0x38d   :  { %2803 = vpow2.f32 %v2404_v26  ;;  %v2169_v28 = vadd.f32 %v2403_v23, %v2160_v27 }
 0x38f   :  { %v2405_v29 = vmul.f32 -1.442695, %v2169_v28 }
 0x391   :  { %2805 = vpow2.f32 %v2405_v29 }
 0x39a   :  { %v2804_v30 = vpop.eup %2803 }
 0x39b   :  { %v2176_v31 = vadd.f32 1.0, %v2804_v30 }
 0x39d   :  { %2807 = vrcp.f32 %v2176_v31 }
 0x39e   :  { %v2806_v32 = vpop.eup %2805 }
 0x39f   :  { %v2177_v33 = vadd.f32 1.0, %v2806_v32 }
 0x3a1   :  { %2809 = vrcp.f32 %v2177_v33 }
 0x3aa   :  { %v2808_v34 = vpop.eup %2807 }
 0x3ab   :  { %2183 = vst.msk [vmem:[%s3643_s15] sm:$0xff] %vm2182_vm9, %v2808_v34 }
 0x3ae   :  { %v2810_v35 = vpop.eup %2809 }
 0x3af   :  { %2184 = vst.msk [vmem:[%s3643_s15 + $0x8] sm:$0xff] %vm2182_vm9, %v2810_v35 }
 0x3b0   :  { %2189 = vsyncpa [#allocation10], 1 }
 0x3b1   :  { %2190 = vsyncpa [#allocation12], 1 }
 0x3b2   :  { %2191 = vsyncpa [#allocation15], 1 }
 0x3b3   :  { %2192 = vsyncpa [#allocation18], 1 }

</bundles_post_ra>
